<compile_context>
chip_gen: v6e
topology: v6e:2x2x1
jax: 0.10.0
libtpu: 0.0.40
codegen_flags: <defaults>
</compile_context>

<pallas_src>
import functools

import jax
import jax.numpy as jnp
from jax.experimental import pallas as pl
from jax.experimental.pallas import tpu as pltpu


def _round_up(x, m):
    return ((x + m - 1) // m) * m


# ---------------------------------------------------------------------------
# Fused kernel: in-kernel embedding gather + multi-width conv + bias + ReLU
#               + max-over-time + FC
# ---------------------------------------------------------------------------
def textcnn_kernel(ids_ref, tbl_ref, w_ref, mask_ref, cb_ref, fcw_ref, fcb_ref,
                   o_ref, *, t_chunk):
    # ids_ref : [bB, Sp]        int32  token ids, -1 sentinel on all padded positions
    # tbl_ref : [Vp, E]         bf16   embedding table (VMEM-resident)
    # w_ref   : [k_max, E, Fp]  bf16   fused conv taps (all branches on the filter axis)
    # mask_ref: [1, T_pad, Fp]  f32    additive time mask {0, -1e30}
    # cb_ref  : [1, Fp] f32 ; fcw_ref: [Fp, Cp] bf16 ; fcb_ref: [1, Cp] f32
    # o_ref   : [bB, Cp]        f32    lane-dense logits
    bB, Sp = ids_ref.shape
    Vp, _ = tbl_ref.shape
    k_max, _, Fp = w_ref.shape
    T_pad = mask_ref.shape[1]
    n_chunks = T_pad // t_chunk

    # --- Embedding gather as a one-hot MXU matmul. ids == -1 never matches the vocab
    #     iota, so padded positions gather an exact zero row (this realises both the
    #     conv zero padding and the T-chunk padding with no extra passes).
    # TODO(synk): for large vocabularies a DMA-gather / jnp.take path would replace the
    # one-hot matmul; at this model's vocab size the table + one-hot are tiny.
    ids = ids_ref[...]
    onehot = (ids[:, :, None] ==
              jax.lax.broadcasted_iota(jnp.int32, (bB, Sp, Vp), 2)).astype(jnp.bfloat16)
    xpad = jax.lax.dot_general(
        onehot, tbl_ref[...],
        dimension_numbers=(((2,), (0,)), ((), ())),
        preferred_element_type=jnp.float32).astype(jnp.bfloat16)      # [bB, Sp, E]

    # --- Fused conv + max-over-time, chunked along T with a running max so the f32
    #     activation tile never exceeds [bB, t_chunk, Fp].
    w_taps = [w_ref[j] for j in range(k_max)]      # each [E, Fp] bf16, loaded once
    mask = mask_ref[...]                           # [1, T_pad, Fp]
    pooled = jnp.full((bB, Fp), -1e30, jnp.float32)
    for c in range(n_chunks):
        t0 = c * t_chunk
        acc = mask[:, t0:t0 + t_chunk, :]          # additive {0,-1e30} seed
        for j in range(k_max):
            acc = acc + jax.lax.dot_general(
                xpad[:, t0 + j:t0 + j + t_chunk, :], w_taps[j],
                dimension_numbers=(((2,), (0,)), ((), ())),
                preferred_element_type=jnp.float32)                    # [bB, Tc, Fp]
        pooled = jnp.maximum(pooled, jnp.max(acc, axis=1))

    # --- Bias + ReLU hoisted after the max (monotone => identical result), fused FC.
    #     Dropout is identity at inference.
    pooled = jnp.maximum(pooled + cb_ref[...], 0.0)
    o_ref[...] = jax.lax.dot_general(
        pooled.astype(jnp.bfloat16), fcw_ref[...],
        dimension_numbers=(((1,), (0,)), ((), ())),
        preferred_element_type=jnp.float32) + fcb_ref[...]


def _pick_block_b(b_pad, per_row_bytes, budget_bytes=8 << 20):
    # b_pad is a multiple of 8; candidates are multiple-of-8 divisors (tile-friendly).
    cands = [d for d in range(8, b_pad + 1, 8) if b_pad % d == 0]
    fitting = [d for d in cands if d * per_row_bytes <= budget_bytes] or [cands[0]]
    multi_step = [d for d in fitting if b_pad // d >= 2]   # >=2 steps: pipeline / v7x
    return max(multi_step) if multi_step else max(fitting)


def textcnn_fused(ids_pad, table, w_all, mask, conv_b, fc_w, fc_b, *, t_chunk):
    B_pad, S_pad = ids_pad.shape
    Vp, E = table.shape
    k_max, _, Fp = w_all.shape
    Cp = fc_w.shape[-1]
    T_pad = mask.shape[1]

    # Per-batch-row VMEM footprint (double-buffered ids, one-hot + gather temps,
    # bf16 xpad, one f32 conv chunk, pooled, double-buffered logits).
    per_row = (2 * S_pad * 4 + S_pad * Vp * 2 + S_pad * E * (4 + 2)
               + t_chunk * Fp * 4 + Fp * 4 + 2 * Cp * 4)
    block_b = _pick_block_b(B_pad, per_row)
    grid = (B_pad // block_b,)

    kernel = functools.partial(textcnn_kernel, t_chunk=t_chunk)
    return pl.pallas_call(
        kernel,
        out_shape=jax.ShapeDtypeStruct((B_pad, Cp), jnp.float32),
        grid=grid,
        in_specs=[
            pl.BlockSpec((block_b, S_pad), lambda i: (i, 0)),      # ids tiled on batch
            pl.BlockSpec((Vp, E), lambda i: (0, 0)),               # table resident
            pl.BlockSpec((k_max, E, Fp), lambda i: (0, 0, 0)),     # conv taps resident
            pl.BlockSpec((1, T_pad, Fp), lambda i: (0, 0, 0)),     # additive mask
            pl.BlockSpec((1, Fp), lambda i: (0, 0)),               # conv bias
            pl.BlockSpec((Fp, Cp), lambda i: (0, 0)),              # fc weight
            pl.BlockSpec((1, Cp), lambda i: (0, 0)),               # fc bias
        ],
        out_specs=pl.BlockSpec((block_b, Cp), lambda i: (i, 0)),
        compiler_params=pltpu.CompilerParams(
            dimension_semantics=("parallel",)),
    )(ids_pad, table, w_all, mask, conv_b, fc_w, fc_b)


# ---------------------------------------------------------------------------
# Full model forward: wrapper only packs parameters / pads ids, then one kernel call
# ---------------------------------------------------------------------------
def cnn_forward(params, x_tokens, lens):
    del lens  # unused, mirrors the PyTorch forward signature
    ks = params["kernel_sizes"]
    k_max = max(ks)
    p = k_max - 1
    V, E = params["embed"].shape
    F = params["conv_w"][0].shape[-1]
    C = params["fc_w"].shape[-1]
    B, S = x_tokens.shape
    F3 = F * len(ks)
    Fp = _round_up(F3, 128)            # lane-dense filter axis
    Cp = _round_up(C, 128)             # lane-dense logit axis (sliced back below)
    Vp = _round_up(V, 128)

    t_chunk = 8
    T = S + k_max - 1                  # time positions covering the widest branch
    T_pad = _round_up(T, t_chunk)
    S_pad = T_pad + k_max - 1          # id positions covering every tap of every chunk

    # Padded token ids: -1 sentinel => zero embedding row inside the kernel.
    ids_pad = jnp.full((B, S_pad), -1, jnp.int32)
    ids_pad = ids_pad.at[:, p:p + S].set(x_tokens.astype(jnp.int32))
    B_pad = _round_up(B, 8)
    if B_pad != B:
        ids_pad = jnp.pad(ids_pad, ((0, B_pad - B), (0, 0)), constant_values=-1)

    table = jnp.pad(params["embed"], ((0, Vp - V), (0, 0))).astype(jnp.bfloat16)

    # Fused conv taps [k_max, E, Fp]: branch with kernel size k uses taps j >= k_max-k.
    w_all = jnp.zeros((k_max, E, F3), jnp.float32)
    for bi, (k, w) in enumerate(zip(ks, params["conv_w"])):      # w: [k, E, F]
        w_all = w_all.at[k_max - k:, :, bi * F:(bi + 1) * F].set(w)
    w_all = jnp.pad(w_all, ((0, 0), (0, 0), (0, Fp - F3))).astype(jnp.bfloat16)

    conv_b = jnp.pad(jnp.concatenate(params["conv_b"], axis=1), ((0, 0), (0, Fp - F3)))

    # Additive time mask {0, -1e30}: branch k is valid for t < S+k-1; pad filter
    # columns see all positions (their conv output is exactly 0 and fc rows are 0).
    t_idx = jnp.arange(T_pad)[:, None]
    tvalid = jnp.concatenate([jnp.full((F,), S + k - 1, jnp.int32) for k in ks])
    tvalid = jnp.pad(tvalid, (0, Fp - F3), constant_values=T_pad)
    mask = jnp.where(t_idx < tvalid[None, :], 0.0, -1e30).astype(jnp.float32)[None]

    fc_w = jnp.pad(params["fc_w"], ((0, Fp - F3), (0, Cp - C))).astype(jnp.bfloat16)
    fc_b = jnp.pad(params["fc_b"], ((0, 0), (0, Cp - C))).astype(jnp.float32)

    out = textcnn_fused(ids_pad, table, w_all, mask, conv_b, fc_w, fc_b,
                        t_chunk=t_chunk)
    return out[:B, :C]


# ---------------------------------------------------------------------------
# Pure-JAX f32 reference (PyTorch semantics) and parameter init
# ---------------------------------------------------------------------------
def cnn_reference(params, x_tokens):
    emb = jnp.take(params["embed"], x_tokens, axis=0)             # [B, S, E]
    S = emb.shape[1]
    pooled = []
    for k, w, b in zip(params["kernel_sizes"], params["conv_w"], params["conv_b"]):
        xp = jnp.pad(emb, ((0, 0), (k - 1, k - 1), (0, 0)))
        t_out = S + k - 1
        acc = jnp.zeros((emb.shape[0], t_out, w.shape[-1]), jnp.float32)
        for dk in range(k):
            acc += jnp.einsum("bte,ef->btf", xp[:, dk:dk + t_out, :], w[dk])
        pooled.append(jnp.max(jax.nn.relu(acc + b[None]), axis=1))
    out = jnp.concatenate(pooled, axis=1)
    return out @ params["fc_w"] + params["fc_b"]


def init_params(key, vocab_size, embed_size, num_classes, num_filters, kernel_sizes):
    keys = jax.random.split(key, 2 + 2 * len(kernel_sizes) + 2)
    ki = iter(keys)
    params = {
        "kernel_sizes": tuple(kernel_sizes),
        "embed": jax.random.normal(next(ki), (vocab_size, embed_size), jnp.float32),
        "conv_w": [],
        "conv_b": [],
    }
    for k in kernel_sizes:
        # PyTorch conv weight is [F, 1, k, E]; stored here as [k, E, F].
        fan_in = 1 * k * embed_size
        bound = 1.0 / jnp.sqrt(fan_in)
        params["conv_w"].append(
            jax.random.uniform(next(ki), (k, embed_size, num_filters),
                               jnp.float32, -bound, bound))
        params["conv_b"].append(
            jax.random.uniform(next(ki), (1, num_filters),
                               jnp.float32, -bound, bound))
    fan_in = len(kernel_sizes) * num_filters
    bound = 1.0 / jnp.sqrt(fan_in)
    params["fc_w"] = jax.random.uniform(
        next(ki), (len(kernel_sizes) * num_filters, num_classes),
        jnp.float32, -bound, bound)
    params["fc_b"] = jax.random.uniform(
        next(ki), (1, num_classes), jnp.float32, -bound, bound)
    return params


if __name__ == "__main__":
    vocab_size = 50
    embed_size = 32
    num_classes = 4
    num_filters = 32
    kernel_sizes = [3, 4, 5]
    batch, seq = 2, 8

    key = jax.random.PRNGKey(0)
    pkey, xkey = jax.random.split(key)
    params = init_params(pkey, vocab_size, embed_size, num_classes,
                         num_filters, kernel_sizes)

    x_tokens = jax.random.randint(xkey, (batch, seq), 0, vocab_size, jnp.int32)
    lens = jnp.full((batch,), seq, jnp.int32)      # unused, mirrors torch signature

    out = cnn_forward(params, x_tokens, lens)
    out = jax.block_until_ready(out)
    assert out.shape == (batch, num_classes), out.shape

    ref = cnn_reference(params, x_tokens)
    err = float(jnp.max(jnp.abs(out - ref)))
    assert err < 0.1, f"max abs error {err}"       # bf16 matmul inputs, f32 accumulation
    print("KERNEL_OK")
</pallas_src>

<mosaic_0001>
module attributes {stable_mosaic.version = 11 : i64} {
  func.func @textcnn_kernel(%arg0: i32, %arg1: memref<8x20xi32, #tpu.memory_space<vmem>>, %arg2: memref<128x32xbf16, #tpu.memory_space<vmem>>, %arg3: memref<5x32x128xbf16, #tpu.memory_space<vmem>>, %arg4: memref<1x16x128xf32, #tpu.memory_space<vmem>>, %arg5: memref<1x128xf32, #tpu.memory_space<vmem>>, %arg6: memref<128x128xbf16, #tpu.memory_space<vmem>>, %arg7: memref<1x128xf32, #tpu.memory_space<vmem>>, %arg8: memref<8x128xf32, #tpu.memory_space<vmem>>) attributes {dimension_semantics = [#tpu.dimension_semantics<parallel>], iteration_bounds = array<i64: 1>, scalar_prefetch = 0 : i64, scratch_operands = 0 : i64, tpu.core_type = #tpu.core_type<tc>, window_params = [{transform_indices = @transform_0, window_bounds = array<i64: 8, 20>}, {pipeline_mode = #tpu.pipeline_mode<synchronous>, transform_indices = @transform_1, window_bounds = array<i64: 128, 32>}, {pipeline_mode = #tpu.pipeline_mode<synchronous>, transform_indices = @transform_2, window_bounds = array<i64: 5, 32, 128>}, {pipeline_mode = #tpu.pipeline_mode<synchronous>, transform_indices = @transform_3, window_bounds = array<i64: 1, 16, 128>}, {pipeline_mode = #tpu.pipeline_mode<synchronous>, transform_indices = @transform_4, window_bounds = array<i64: 1, 128>}, {pipeline_mode = #tpu.pipeline_mode<synchronous>, transform_indices = @transform_5, window_bounds = array<i64: 128, 128>}, {pipeline_mode = #tpu.pipeline_mode<synchronous>, transform_indices = @transform_6, window_bounds = array<i64: 1, 128>}, {transform_indices = @transform_7, window_bounds = array<i64: 8, 128>}]} {
    %c0 = arith.constant 0 : index
    %c0_0 = arith.constant 0 : index
    %0 = vector.load %arg1[%c0, %c0_0] : memref<8x20xi32, #tpu.memory_space<vmem>>, vector<8x20xi32>
    %1 = vector.shape_cast %0 : vector<8x20xi32> to vector<8x20x1xi32>
    %2 = tpu.iota {dimensions = array<i32: 2>} : vector<8x20x128xi32>
    %3 = vector.broadcast %1 : vector<8x20x1xi32> to vector<8x20x128xi32>
    %4 = arith.cmpi eq, %3, %2 : vector<8x20x128xi32>
    %5 = arith.extui %4 : vector<8x20x128xi1> to vector<8x20x128xi32>
    %6 = arith.sitofp %5 : vector<8x20x128xi32> to vector<8x20x128xf32>
    %7 = arith.truncf %6 : vector<8x20x128xf32> to vector<8x20x128xbf16>
    %c0_1 = arith.constant 0 : index
    %c0_2 = arith.constant 0 : index
    %8 = vector.load %arg2[%c0_1, %c0_2] : memref<128x32xbf16, #tpu.memory_space<vmem>>, vector<128x32xbf16>
    %cst = arith.constant dense<0.000000e+00> : vector<8x20x32xf32>
    %9 = tpu.matmul %7, %8, %cst {dimension_numbers = #tpu.dot_dimension_numbers<[2], [0], [0, 1], [1], [0, 0, 0, 1, 1, 1], [], []>} : vector<8x20x128xbf16>, vector<128x32xbf16>, vector<8x20x32xf32> -> vector<8x20x32xf32>
    %10 = arith.truncf %9 : vector<8x20x32xf32> to vector<8x20x32xbf16>
    %c0_3 = arith.constant 0 : index
    %c0_4 = arith.constant 0 : index
    %c0_5 = arith.constant 0 : index
    %11 = vector.load %arg3[%c0_3, %c0_4, %c0_5] : memref<5x32x128xbf16, #tpu.memory_space<vmem>>, vector<1x32x128xbf16>
    %12 = vector.shape_cast %11 : vector<1x32x128xbf16> to vector<32x128xbf16>
    %c1 = arith.constant 1 : index
    %c0_6 = arith.constant 0 : index
    %c0_7 = arith.constant 0 : index
    %13 = vector.load %arg3[%c1, %c0_6, %c0_7] : memref<5x32x128xbf16, #tpu.memory_space<vmem>>, vector<1x32x128xbf16>
    %14 = vector.shape_cast %13 : vector<1x32x128xbf16> to vector<32x128xbf16>
    %c2 = arith.constant 2 : index
    %c0_8 = arith.constant 0 : index
    %c0_9 = arith.constant 0 : index
    %15 = vector.load %arg3[%c2, %c0_8, %c0_9] : memref<5x32x128xbf16, #tpu.memory_space<vmem>>, vector<1x32x128xbf16>
    %16 = vector.shape_cast %15 : vector<1x32x128xbf16> to vector<32x128xbf16>
    %c3 = arith.constant 3 : index
    %c0_10 = arith.constant 0 : index
    %c0_11 = arith.constant 0 : index
    %17 = vector.load %arg3[%c3, %c0_10, %c0_11] : memref<5x32x128xbf16, #tpu.memory_space<vmem>>, vector<1x32x128xbf16>
    %18 = vector.shape_cast %17 : vector<1x32x128xbf16> to vector<32x128xbf16>
    %c4 = arith.constant 4 : index
    %c0_12 = arith.constant 0 : index
    %c0_13 = arith.constant 0 : index
    %19 = vector.load %arg3[%c4, %c0_12, %c0_13] : memref<5x32x128xbf16, #tpu.memory_space<vmem>>, vector<1x32x128xbf16>
    %20 = vector.shape_cast %19 : vector<1x32x128xbf16> to vector<32x128xbf16>
    %c0_14 = arith.constant 0 : index
    %c0_15 = arith.constant 0 : index
    %c0_16 = arith.constant 0 : index
    %21 = vector.load %arg4[%c0_14, %c0_15, %c0_16] : memref<1x16x128xf32, #tpu.memory_space<vmem>>, vector<1x16x128xf32>
    %cst_17 = arith.constant -1.000000e+30 : f32
    %22 = vector.broadcast %cst_17 : f32 to vector<8x128xf32>
    %23 = vector.extract_strided_slice %21 {offsets = [0, 0, 0], sizes = [1, 8, 128], strides = [1, 1, 1]} : vector<1x16x128xf32> to vector<1x8x128xf32>
    %24 = vector.extract_strided_slice %10 {offsets = [0, 0, 0], sizes = [8, 8, 32], strides = [1, 1, 1]} : vector<8x20x32xbf16> to vector<8x8x32xbf16>
    %cst_18 = arith.constant dense<0.000000e+00> : vector<8x8x128xf32>
    %25 = tpu.matmul %24, %12, %cst_18 {dimension_numbers = #tpu.dot_dimension_numbers<[2], [0], [0, 1], [1], [0, 0, 0, 1, 1, 1], [], []>} : vector<8x8x32xbf16>, vector<32x128xbf16>, vector<8x8x128xf32> -> vector<8x8x128xf32>
    %26 = vector.broadcast %23 : vector<1x8x128xf32> to vector<8x8x128xf32>
    %27 = arith.addf %26, %25 : vector<8x8x128xf32>
    %28 = vector.extract_strided_slice %10 {offsets = [0, 1, 0], sizes = [8, 8, 32], strides = [1, 1, 1]} : vector<8x20x32xbf16> to vector<8x8x32xbf16>
    %cst_19 = arith.constant dense<0.000000e+00> : vector<8x8x128xf32>
    %29 = tpu.matmul %28, %14, %cst_19 {dimension_numbers = #tpu.dot_dimension_numbers<[2], [0], [0, 1], [1], [0, 0, 0, 1, 1, 1], [], []>} : vector<8x8x32xbf16>, vector<32x128xbf16>, vector<8x8x128xf32> -> vector<8x8x128xf32>
    %30 = arith.addf %27, %29 : vector<8x8x128xf32>
    %31 = vector.extract_strided_slice %10 {offsets = [0, 2, 0], sizes = [8, 8, 32], strides = [1, 1, 1]} : vector<8x20x32xbf16> to vector<8x8x32xbf16>
    %cst_20 = arith.constant dense<0.000000e+00> : vector<8x8x128xf32>
    %32 = tpu.matmul %31, %16, %cst_20 {dimension_numbers = #tpu.dot_dimension_numbers<[2], [0], [0, 1], [1], [0, 0, 0, 1, 1, 1], [], []>} : vector<8x8x32xbf16>, vector<32x128xbf16>, vector<8x8x128xf32> -> vector<8x8x128xf32>
    %33 = arith.addf %30, %32 : vector<8x8x128xf32>
    %34 = vector.extract_strided_slice %10 {offsets = [0, 3, 0], sizes = [8, 8, 32], strides = [1, 1, 1]} : vector<8x20x32xbf16> to vector<8x8x32xbf16>
    %cst_21 = arith.constant dense<0.000000e+00> : vector<8x8x128xf32>
    %35 = tpu.matmul %34, %18, %cst_21 {dimension_numbers = #tpu.dot_dimension_numbers<[2], [0], [0, 1], [1], [0, 0, 0, 1, 1, 1], [], []>} : vector<8x8x32xbf16>, vector<32x128xbf16>, vector<8x8x128xf32> -> vector<8x8x128xf32>
    %36 = arith.addf %33, %35 : vector<8x8x128xf32>
    %37 = vector.extract_strided_slice %10 {offsets = [0, 4, 0], sizes = [8, 8, 32], strides = [1, 1, 1]} : vector<8x20x32xbf16> to vector<8x8x32xbf16>
    %cst_22 = arith.constant dense<0.000000e+00> : vector<8x8x128xf32>
    %38 = tpu.matmul %37, %20, %cst_22 {dimension_numbers = #tpu.dot_dimension_numbers<[2], [0], [0, 1], [1], [0, 0, 0, 1, 1, 1], [], []>} : vector<8x8x32xbf16>, vector<32x128xbf16>, vector<8x8x128xf32> -> vector<8x8x128xf32>
    %39 = arith.addf %36, %38 : vector<8x8x128xf32>
    %cst_23 = arith.constant dense<0xFF800000> : vector<8x128xf32>
    %40 = vector.multi_reduction <maximumf>, %39, %cst_23 [1] : vector<8x8x128xf32> to vector<8x128xf32>
    %41 = arith.maximumf %22, %40 : vector<8x128xf32>
    %42 = vector.extract_strided_slice %21 {offsets = [0, 8, 0], sizes = [1, 8, 128], strides = [1, 1, 1]} : vector<1x16x128xf32> to vector<1x8x128xf32>
    %43 = vector.extract_strided_slice %10 {offsets = [0, 8, 0], sizes = [8, 8, 32], strides = [1, 1, 1]} : vector<8x20x32xbf16> to vector<8x8x32xbf16>
    %cst_24 = arith.constant dense<0.000000e+00> : vector<8x8x128xf32>
    %44 = tpu.matmul %43, %12, %cst_24 {dimension_numbers = #tpu.dot_dimension_numbers<[2], [0], [0, 1], [1], [0, 0, 0, 1, 1, 1], [], []>} : vector<8x8x32xbf16>, vector<32x128xbf16>, vector<8x8x128xf32> -> vector<8x8x128xf32>
    %45 = vector.broadcast %42 : vector<1x8x128xf32> to vector<8x8x128xf32>
    %46 = arith.addf %45, %44 : vector<8x8x128xf32>
    %47 = vector.extract_strided_slice %10 {offsets = [0, 9, 0], sizes = [8, 8, 32], strides = [1, 1, 1]} : vector<8x20x32xbf16> to vector<8x8x32xbf16>
    %cst_25 = arith.constant dense<0.000000e+00> : vector<8x8x128xf32>
    %48 = tpu.matmul %47, %14, %cst_25 {dimension_numbers = #tpu.dot_dimension_numbers<[2], [0], [0, 1], [1], [0, 0, 0, 1, 1, 1], [], []>} : vector<8x8x32xbf16>, vector<32x128xbf16>, vector<8x8x128xf32> -> vector<8x8x128xf32>
    %49 = arith.addf %46, %48 : vector<8x8x128xf32>
    %50 = vector.extract_strided_slice %10 {offsets = [0, 10, 0], sizes = [8, 8, 32], strides = [1, 1, 1]} : vector<8x20x32xbf16> to vector<8x8x32xbf16>
    %cst_26 = arith.constant dense<0.000000e+00> : vector<8x8x128xf32>
    %51 = tpu.matmul %50, %16, %cst_26 {dimension_numbers = #tpu.dot_dimension_numbers<[2], [0], [0, 1], [1], [0, 0, 0, 1, 1, 1], [], []>} : vector<8x8x32xbf16>, vector<32x128xbf16>, vector<8x8x128xf32> -> vector<8x8x128xf32>
    %52 = arith.addf %49, %51 : vector<8x8x128xf32>
    %53 = vector.extract_strided_slice %10 {offsets = [0, 11, 0], sizes = [8, 8, 32], strides = [1, 1, 1]} : vector<8x20x32xbf16> to vector<8x8x32xbf16>
    %cst_27 = arith.constant dense<0.000000e+00> : vector<8x8x128xf32>
    %54 = tpu.matmul %53, %18, %cst_27 {dimension_numbers = #tpu.dot_dimension_numbers<[2], [0], [0, 1], [1], [0, 0, 0, 1, 1, 1], [], []>} : vector<8x8x32xbf16>, vector<32x128xbf16>, vector<8x8x128xf32> -> vector<8x8x128xf32>
    %55 = arith.addf %52, %54 : vector<8x8x128xf32>
    %56 = vector.extract_strided_slice %10 {offsets = [0, 12, 0], sizes = [8, 8, 32], strides = [1, 1, 1]} : vector<8x20x32xbf16> to vector<8x8x32xbf16>
    %cst_28 = arith.constant dense<0.000000e+00> : vector<8x8x128xf32>
    %57 = tpu.matmul %56, %20, %cst_28 {dimension_numbers = #tpu.dot_dimension_numbers<[2], [0], [0, 1], [1], [0, 0, 0, 1, 1, 1], [], []>} : vector<8x8x32xbf16>, vector<32x128xbf16>, vector<8x8x128xf32> -> vector<8x8x128xf32>
    %58 = arith.addf %55, %57 : vector<8x8x128xf32>
    %cst_29 = arith.constant dense<0xFF800000> : vector<8x128xf32>
    %59 = vector.multi_reduction <maximumf>, %58, %cst_29 [1] : vector<8x8x128xf32> to vector<8x128xf32>
    %60 = arith.maximumf %41, %59 : vector<8x128xf32>
    %c0_30 = arith.constant 0 : index
    %c0_31 = arith.constant 0 : index
    %61 = vector.load %arg5[%c0_30, %c0_31] : memref<1x128xf32, #tpu.memory_space<vmem>>, vector<1x128xf32>
    %62 = vector.broadcast %61 : vector<1x128xf32> to vector<8x128xf32>
    %63 = arith.addf %60, %62 : vector<8x128xf32>
    %cst_32 = arith.constant 0.000000e+00 : f32
    %64 = vector.broadcast %cst_32 : f32 to vector<8x128xf32>
    %65 = arith.maximumf %63, %64 : vector<8x128xf32>
    %66 = arith.truncf %65 : vector<8x128xf32> to vector<8x128xbf16>
    %c0_33 = arith.constant 0 : index
    %c0_34 = arith.constant 0 : index
    %67 = vector.load %arg6[%c0_33, %c0_34] : memref<128x128xbf16, #tpu.memory_space<vmem>>, vector<128x128xbf16>
    %cst_35 = arith.constant dense<0.000000e+00> : vector<8x128xf32>
    %68 = tpu.matmul %66, %67, %cst_35 {dimension_numbers = #tpu.dot_dimension_numbers<[1], [0], [0], [1], [0, 0, 1, 1], [], []>} : vector<8x128xbf16>, vector<128x128xbf16>, vector<8x128xf32> -> vector<8x128xf32>
    %c0_36 = arith.constant 0 : index
    %c0_37 = arith.constant 0 : index
    %69 = vector.load %arg7[%c0_36, %c0_37] : memref<1x128xf32, #tpu.memory_space<vmem>>, vector<1x128xf32>
    %70 = vector.broadcast %69 : vector<1x128xf32> to vector<8x128xf32>
    %71 = arith.addf %68, %70 : vector<8x128xf32>
    %c0_38 = arith.constant 0 : index
    %c0_39 = arith.constant 0 : index
    %72 = vector.load %arg8[%c0_38, %c0_39] : memref<8x128xf32, #tpu.memory_space<vmem>>, vector<8x128xf32>
    tpu.vector_store %arg8[%c0_38, %c0_39], %71 {strides = array<i32>} : memref<8x128xf32, #tpu.memory_space<vmem>>, vector<8x128xf32>,
    return
  }
  func.func @transform_0(%arg0: i32) -> (i32, i32) {
    %c0_i32 = arith.constant 0 : i32
    %c0_i32_0 = arith.constant 0 : i32
    return %arg0, %c0_i32 : i32, i32
  }
  func.func @transform_1(%arg0: i32) -> (i32, i32) {
    %c0_i32 = arith.constant 0 : i32
    %c0_i32_0 = arith.constant 0 : i32
    %c0_i32_1 = arith.constant 0 : i32
    return %c0_i32, %c0_i32_0 : i32, i32
  }
  func.func @transform_2(%arg0: i32) -> (i32, i32, i32) {
    %c0_i32 = arith.constant 0 : i32
    %c0_i32_0 = arith.constant 0 : i32
    %c0_i32_1 = arith.constant 0 : i32
    %c0_i32_2 = arith.constant 0 : i32
    return %c0_i32, %c0_i32_0, %c0_i32_1 : i32, i32, i32
  }
  func.func @transform_3(%arg0: i32) -> (i32, i32, i32) {
    %c0_i32 = arith.constant 0 : i32
    %c0_i32_0 = arith.constant 0 : i32
    %c0_i32_1 = arith.constant 0 : i32
    %c0_i32_2 = arith.constant 0 : i32
    return %c0_i32, %c0_i32_0, %c0_i32_1 : i32, i32, i32
  }
  func.func @transform_4(%arg0: i32) -> (i32, i32) {
    %c0_i32 = arith.constant 0 : i32
    %c0_i32_0 = arith.constant 0 : i32
    %c0_i32_1 = arith.constant 0 : i32
    return %c0_i32, %c0_i32_0 : i32, i32
  }
  func.func @transform_5(%arg0: i32) -> (i32, i32) {
    %c0_i32 = arith.constant 0 : i32
    %c0_i32_0 = arith.constant 0 : i32
    %c0_i32_1 = arith.constant 0 : i32
    return %c0_i32, %c0_i32_0 : i32, i32
  }
  func.func @transform_6(%arg0: i32) -> (i32, i32) {
    %c0_i32 = arith.constant 0 : i32
    %c0_i32_0 = arith.constant 0 : i32
    %c0_i32_1 = arith.constant 0 : i32
    return %c0_i32, %c0_i32_0 : i32, i32
  }
  func.func @transform_7(%arg0: i32) -> (i32, i32) {
    %c0_i32 = arith.constant 0 : i32
    %c0_i32_0 = arith.constant 0 : i32
    return %arg0, %c0_i32 : i32, i32
  }
}

</mosaic_0001>

<bundles_post_ra>
// kernel: tpu_custom_call.1
= control target key start
LH: loop header
LB: loop body
LE: loop exit
PB: predicated region body
PF: predicated region fallthrough
CT: control target
= control target key end

     0   :  { %12 = vsyncpa [#allocation3], 0  ;;  %s4673_s0 = inlined_call_operand.hbm [shape: s32[8,20], index: 0, kind: input, shape index: {}]   ;;  %s4674_s1 = inlined_call_operand.vmem [shape: bf16[128,32], index: 1, kind: input, shape index: {}]   ;;  %s4675_s2 = inlined_call_operand.vmem [shape: bf16[5,32,128], index: 2, kind: input, shape index: {}]   ;;  %s4676_s3 = inlined_call_operand.hbm [shape: f32[1,16,128], index: 3, kind: input, shape index: {}]   ;;  %s4677_s4 = inlined_call_operand.vmem [shape: f32[1,128], index: 4, kind: input, shape index: {}]   ;;  %s4678_s5 = inlined_call_operand.hbm [shape: bf16[128,128], index: 5, kind: input, shape index: {}]   ;;  %s4679_s6 = inlined_call_operand.vmem [shape: f32[1,128], index: 6, kind: input, shape index: {}]   ;;  %s4680_s7 = inlined_call_operand.hbm [shape: f32[8,128], index: 7, kind: output, shape index: {}]  }
   0x1   :  { %13 = vsyncpa [#allocation6], 0 }
   0x2   :  { %14 = vsyncpa [#allocation4], 0  ;;  %s3402_s24 = smov [#allocation5]  }
   0x3   :  { %s34_s25 = sshll.u32 %s3402_s24, 4  ;;  %s35_s25 = int_to_ptr.vmem [resolvable:$true] %s34_s25 }
   0x4   :  { %s3324_s26 = scalar_lea.vmem %s35_s25, 256  ;;  %p3329_p1 = scmp.lt.s32.totalorder %s35_s25, %s35_s25 }
   0x5   :  { %p3325_p0 = scmp.ne.s32.totalorder %s35_s25, %s3324_s26  ;;  %p3330_p2 = scmp.lt.s32.totalorder %s3324_s26, %s3324_s26 }
   0x7   :  { %p3331_p3 = por %p3330_p2, %p3329_p1 }
   0x9   :  { %p3332_p4 = pnand %p3331_p3, %p3325_p0 }
   0xb   :  { %3335 = shalt.err (!%p3332_p4)
}
   0xc   :  { %s3403_s27 = smov 128   ;;  %s3404_s28 = smov 8  }
   0xd   :  { %40 = dma.hbm_to_vmem [thread:$0]  %s4676_s3, 256, %s35_s25, [#allocation6], %s3403_s27, %s3403_s27, %s3404_s28  }
   0xe   :  { %s3405_s8 = smov [#allocation2]   ;;  %s3406_s10 = smov [#allocation7]  }
   0xf   :  { %s21_s9 = sshll.u32 %s3405_s8, 4  ;;  %s48_s11 = sshll.u32 %s3406_s10, 4  ;;  %s22_s9 = int_to_ptr.vmem [resolvable:$true] %s21_s9  ;;  %s49_s11 = int_to_ptr.vmem [resolvable:$true] %s48_s11 }
  0x10   :  { %s3344_s12 = scalar_lea.vmem %s22_s9, 128  ;;  %p3349_p6 = scmp.lt.s32.totalorder %s22_s9, %s22_s9 }
  0x11   :  { %p3345_p5 = scmp.ne.s32.totalorder %s22_s9, %s3344_s12  ;;  %p3350_p7 = scmp.lt.s32.totalorder %s3344_s12, %s3344_s12 }
  0x13   :  { %p3351_p8 = por %p3350_p7, %p3349_p6 }
  0x15   :  { %p3352_p9 = pnand %p3351_p8, %p3345_p5 }
  0x17   :  { %3355 = shalt.err (!%p3352_p9)
}
  0x18   :  { %24 = dma.hbm_to_vmem [thread:$0]  %s4673_s0, 128, %s22_s9, [#allocation3]  }
  0x19   :  { %s3364_s15 = scalar_lea.vmem %s49_s11, 1024  ;;  %p3369_p11 = scmp.lt.s32.totalorder %s49_s11, %s49_s11 }
  0x1a   :  { %p3365_p10 = scmp.ne.s32.totalorder %s49_s11, %s3364_s15  ;;  %p3370_p12 = scmp.lt.s32.totalorder %s3364_s15, %s3364_s15 }
  0x1c   :  { %p3371_p13 = por %p3370_p12, %p3369_p11 }
  0x1e   :  { %p3372_p0 = pnand %p3371_p13, %p3365_p10 }
  0x20   :  { %3375 = shalt.err (!%p3372_p0)
}
  0x21   :  { %s3407_s3 = smov 64   ;;  %s3408_s16 = smov 4  }
  0x22   :  { %54 = dma.hbm_to_vmem [thread:$0]  %s4678_s5, 1024, %s49_s11, [#allocation6], %s3407_s3, %s3407_s3, %s3408_s16  }
  0x23   :  { %3396 = dma.done.wait [#allocation3], 128  }
  0x24   :  { %3397 = vsyncadd [#allocation3], 4294967168 }
  0x25   :  { %3398 = dma.done.wait [#allocation6], 1280  }
  0x26   :  { %3399 = vsyncadd [#allocation6], 4294966016  ;;  %v68_v0 = vlaneseq  ;;  %v67_v4 = vld [vmem:[#allocation2] sm:$0xff]  ;;  %v3288_v7 = vld [vmem:[%s4674_s1 + $0x38] sm:$0xff]   ;;  %v3409_v27 = vmov 1983009808  }
  0x27   :  { %v3289_v8 = vld [vmem:[%s4674_s1 + $0x30] sm:$0xff]   ;;  %3101 = vmatprep.subr.bf16.mxu0 %v3288_v7  ;;  %v3290_v10 = vld [vmem:[%s4674_s1 + $0x28] sm:$0xff]   ;;  %v3291_v14 = vld [vmem:[%s4674_s1 + $0x20] sm:$0xff]   ;;  %v312_v28 = vunpack.c.l.s4 %v3409_v27  ;;  %v4682_v36 = vmov 0.0   ;;  %s3412_s9 = smov [#allocation8]  }
  0x28   :  { %v3463_v1 = vshrl.u32 %v68_v0, 7  ;;  %3102 = vmatpush3.bf16.msra.mxu0 %v3288_v7  ;;  %v3292_v15 = vld [vmem:[%s4674_s1 + $0x18] sm:$0xff]   ;;  %v3293_v17 = vld [vmem:[%s4674_s1 + $0x10] sm:$0xff]   ;;  %v3294_v19 = vld [vmem:[%s4674_s1 + $0x8] sm:$0xff]   ;;  %v3498_v29 = vand.u32 127, %v68_v0 }
  0x29   :  { %3103 = vmatprep.subr.bf16.mxu0 %v3289_v8  ;;  %v3295_v21 = vld [vmem:[%s4674_s1] sm:$0xff]   ;;  %v313_v32 = vunpack.c.0.s8 %v312_v28  ;;  %s2776_s1 = sshll.u32 %s3412_s9, 4  ;;  %s2777_s1 = int_to_ptr.vmem [resolvable:$true] %s2776_s1 }
  0x2a   :  { %v85_v2 = vsub.s32 1, %v3463_v1  ;;  %v70_v3 = vsub.s32 0, %v3463_v1  ;;  %v100_v9 = vsub.s32 2, %v3463_v1  ;;  %v115_v12 = vsub.s32 3, %v3463_v1  ;;  %s3376_s10 = scalar_lea.vmem %s2777_s1, 128  ;;  %p3381_p2 = scmp.lt.s32.totalorder %s2777_s1, %s2777_s1 }
  0x2b   :  { %v130_v13 = vsub.s32 4, %v3463_v1  ;;  %v145_v20 = vsub.s32 5, %v3463_v1  ;;  %v160_v23 = vsub.s32 6, %v3463_v1  ;;  %v175_v25 = vsub.s32 7, %v3463_v1  ;;  %p3377_p1 = scmp.ne.s32.totalorder %s2777_s1, %s3376_s10  ;;  %p3382_p3 = scmp.lt.s32.totalorder %s3376_s10, %s3376_s10 }
  0x2c   :  { %v86_v5 = vrot.slane %v67_v4, %v85_v2  ;;  %v71_v6 = vrot.slane %v67_v4, %v70_v3  ;;  %v101_v11 = vrot.slane %v67_v4, %v100_v9  ;;  %3104 = vmatpush3.bf16.msra.mxu0 %v3289_v8  ;;  %v116_v16 = vrot.slane %v67_v4, %v115_v12 }
  0x2d   :  { %3105 = vmatprep.subr.bf16.mxu0 %v3290_v10  ;;  %v131_v18 = vrot.slane %v67_v4, %v130_v13  ;;  %v146_v22 = vrot.slane %v67_v4, %v145_v20  ;;  %v161_v24 = vrot.slane %v67_v4, %v160_v23  ;;  %v176_v26 = vrot.slane %v67_v4, %v175_v25  ;;  %p3383_p4 = por %p3382_p3, %p3381_p2 }
  0x2e   :  { %88 = vbcast.lane.b32.xlu1 %v86_v5, 256  ;;  %73 = vbcast.lane.b32.xlu0 %v71_v6, 256  ;;  %v3503_v35 = vsub.s32 %v313_v32, %v3463_v1 }
  0x2f   :  { %p3384_p5 = pnand %p3383_p4, %p3377_p1 }
  0x30   :  { %3106 = vmatpush3.bf16.msra.mxu0 %v3290_v10 }
  0x31   :  { %3107 = vmatprep.subr.bf16.mxu0 %v3291_v14 }
  0x32   :  { %92 = vbcast.lane.b32.xlu1 %v86_v5, 264  ;;  %77 = vbcast.lane.b32.xlu0 %v71_v6, 264 }
  0x34   :  { %3108 = vmatpush3.bf16.msra.mxu0 %v3291_v14 }
  0x35   :  { %3109 = vmatprep.subr.bf16.mxu0 %v3292_v15 }
  0x36   :  { %103 = vbcast.lane.b32.xlu1 %v101_v11, 256  ;;  %81 = vbcast.lane.b32.xlu0 %v71_v6, 272 }
  0x38   :  { %3110 = vmatpush3.bf16.msra.mxu0 %v3292_v15 }
  0x39   :  { %3111 = vmatprep.subr.bf16.mxu0 %v3293_v17 }
  0x3a   :  { %96 = vbcast.lane.b32.xlu1 %v86_v5, 272  ;;  %107 = vbcast.lane.b32.xlu0 %v101_v11, 264 }
  0x3c   :  { %3112 = vmatpush3.bf16.msra.mxu0 %v3293_v17 }
  0x3d   :  { %3113 = vmatprep.subr.bf16.mxu0 %v3294_v19 }
  0x3e   :  { %118 = vbcast.lane.b32.xlu1 %v116_v16, 256  ;;  %111 = vbcast.lane.b32.xlu0 %v101_v11, 272 }
  0x40   :  { %3114 = vmatpush3.bf16.msra.mxu0 %v3294_v19 }
  0x41   :  { %3115 = vmatprep.subr.bf16.mxu0 %v3295_v21 }
  0x42   :  { %133 = vbcast.lane.b32.xlu1 %v131_v18, 256  ;;  %122 = vbcast.lane.b32.xlu0 %v116_v16, 264 }
  0x44   :  { %3116 = vmatpush3.bf16.msra.mxu0 %v3295_v21 }
  0x46   :  { %126 = vbcast.lane.b32.xlu1 %v116_v16, 272  ;;  %137 = vbcast.lane.b32.xlu0 %v131_v18, 264 }
  0x4a   :  { %152 = vbcast.lane.b32.xlu1 %v146_v22, 264  ;;  %148 = vbcast.lane.b32.xlu0 %v146_v22, 256 }
  0x4e   :  { %167 = vbcast.lane.b32.xlu1 %v161_v24, 264  ;;  %163 = vbcast.lane.b32.xlu0 %v161_v24, 256 }
  0x52   :  { %156 = vbcast.lane.b32.xlu1 %v146_v22, 272  ;;  %141 = vbcast.lane.b32.xlu0 %v131_v18, 272 }
  0x56   :  { %182 = vbcast.lane.b32.xlu1 %v176_v26, 264  ;;  %178 = vbcast.lane.b32.xlu0 %v176_v26, 256 }
  0x5a   :  { %186 = vbcast.lane.b32.xlu1 %v176_v26, 272  ;;  %171 = vbcast.lane.b32.xlu0 %v161_v24, 272 }
  0xa0   :  { %v89_v30 = vpop.permute.xlu1 %88  ;;  %v74_v31 = vpop.permute.xlu0 %73 }
  0xa1   :  { %vm193_vm0 = vcmp.eq.s32.totalorder %v89_v30, %v3498_v29  ;;  %vm190_vm1 = vcmp.eq.s32.totalorder %v74_v31, %v3498_v29 }
  0xa2   :  { %v2789_v37 = vsel %vm193_vm0, 1.0, %v4682_v36  ;;  %v2786_v38 = vsel %vm190_vm1, 1.0, %v4682_v36 }
  0xa4   :  { %v93_v33 = vpop.permute.xlu1 %92  ;;  %v78_v34 = vpop.permute.xlu0 %77 }
  0xa5   :  { %vm194_vm2 = vcmp.eq.s32.totalorder %v93_v33, %v3498_v29  ;;  %vm191_vm3 = vcmp.eq.s32.totalorder %v78_v34, %v3498_v29 }
  0xa6   :  { %v2790_v39 = vsel %vm194_vm2, 1.0, %v4682_v36  ;;  %v2787_v40 = vsel %vm191_vm3, 1.0, %v4682_v36 }
  0xa7   :  { %v264_v41 = vpack.c.bf16 %v2790_v39, %v2789_v37  ;;  %v2811_v42 = vpack.c.bf16 %v2790_v39, %v2790_v39  ;;  %v262_v43 = vpack.c.bf16 %v2787_v40, %v2786_v38  ;;  %v2810_v44 = vpack.c.bf16 %v2787_v40, %v2787_v40 }
  0xa8   :  { %v104_v45 = vpop.permute.xlu1 %103  ;;  %v82_v46 = vpop.permute.xlu0 %81 }
  0xa9   :  { %v341_v47 = vrot.slane %v264_v41, %v3503_v35  ;;  %v348_v48 = vrot.slane %v2811_v42, %v3503_v35  ;;  %v317_v49 = vrot.slane %v262_v43, %v3503_v35  ;;  %v324_v50 = vrot.slane %v2810_v44, %v3503_v35 }
  0xaa   :  { %vm196_vm4 = vcmp.eq.s32.totalorder %v104_v45, %v3498_v29  ;;  %vm192_vm5 = vcmp.eq.s32.totalorder %v82_v46, %v3498_v29 }
  0xab   :  { %v349_v51 = vcombine.high %v341_v47, %v341_v47  ;;  %v2788_v52 = vsel %vm192_vm5, 1.0, %v4682_v36  ;;  %v325_v56 = vcombine.high %v317_v49, %v317_v49  ;;  %v326_v57 = vcombine.high %v324_v50, %v324_v50 }
  0xac   :  { %v263_v53 = vpack.c.bf16 %v2788_v52, %v2788_v52  ;;  %v97_v54 = vpop.permute.xlu1 %96  ;;  %v108_v55 = vpop.permute.xlu0 %107  ;;  %v2792_v59 = vsel %vm196_vm4, 1.0, %v4682_v36  ;;  %v350_v9 = vcombine.high %v348_v48, %v348_v48 }
  0xad   :  { %v520_v58 = vcombine.low %v349_v51, %v348_v48  ;;  %vm195_vm6 = vcmp.eq.s32.totalorder %v97_v54, %v3498_v29  ;;  %vm197_vm7 = vcmp.eq.s32.totalorder %v108_v55, %v3498_v29  ;;  %v502_v63 = vcombine.low %v317_v49, %v325_v56 }
  0xae   :  { %v333_v60 = vrot.slane %v263_v53, %v3503_v35  ;;  %v2791_v61 = vsel %vm195_vm6, 1.0, %v4682_v36  ;;  %v2793_v62 = vsel %vm197_vm7, 1.0, %v4682_v36  ;;  %v503_v3 = vcombine.low %v324_v50, %v326_v57 }
  0xaf   :  { %v265_v0 = vpack.c.bf16 %v2791_v61, %v2791_v61  ;;  %v266_v1 = vpack.c.bf16 %v2793_v62, %v2792_v59  ;;  %v2812_v2 = vpack.c.bf16 %v2793_v62, %v2793_v62  ;;  %v510_v7 = vrot.slane %v502_v63, %v3503_v35 }
  0xb0   :  { %v519_v4 = vcombine.low %v333_v60, %v341_v47  ;;  %v119_v5 = vpop.permute.xlu1 %118  ;;  %v112_v6 = vpop.permute.xlu0 %111  ;;  %v534_v8 = vrot.slane %v520_v58, %v3503_v35  ;;  %v517_v13 = vrot.slane %v503_v3, %v3503_v35 }
  0xb1   :  { %v357_v10 = vrot.slane %v265_v0, %v3503_v35  ;;  %v365_v11 = vrot.slane %v266_v1, %v3503_v35  ;;  %v372_v12 = vrot.slane %v2812_v2, %v3503_v35  ;;  %vm199_vm8 = vcmp.eq.s32.totalorder %v119_v5, %v3498_v29 }
  0xb2   :  { %vm198_vm9 = vcmp.eq.s32.totalorder %v112_v6, %v3498_v29  ;;  %v527_v14 = vrot.slane %v519_v4, %v3503_v35  ;;  %v518_v20 = vcombine.low %v510_v7, %v517_v13  ;;  %v2795_v26 = vsel %vm199_vm8, 1.0, %v4682_v36 }
  0xb3   :  { %v536_v15 = vcombine.low %v350_v9, %v357_v10  ;;  %v373_v16 = vcombine.high %v365_v11, %v365_v11  ;;  %v374_v17 = vcombine.high %v372_v12, %v372_v12  ;;  %v2794_v18 = vsel %vm198_vm9, 1.0, %v4682_v36 }
  0xb4   :  { %v267_v19 = vpack.c.bf16 %v2794_v18, %v2794_v18  ;;  %v134_v21 = vpop.permute.xlu1 %133  ;;  %v123_v22 = vpop.permute.xlu0 %122  ;;  %v535_v23 = vcombine.low %v527_v14, %v534_v8  ;;  %3117 = vmatprep.mubr.bf16.mxu0 %v518_v20  ;;  %vm993_vm8 = vcmask 261120   ;;  %vm1327_vm9 = vcmask 1042432  }
  0xb5   :  { %v537_v24 = vcombine.low %v365_v11, %v373_v16  ;;  %v553_v25 = vcombine.low %v372_v12, %v374_v17  ;;  %vm200_vm10 = vcmp.eq.s32.totalorder %v123_v22, %v3498_v29  ;;  %v544_v30 = vrot.slane %v536_v15, %v3503_v35 }
  0xb6   :  { %v381_v27 = vrot.slane %v267_v19, %v3503_v35  ;;  %v2796_v28 = vsel %vm200_vm10, 1.0, %v4682_v36  ;;  %3118 = vmatmul.mubr.bf16.vlgmr.msra.gmra.mxu0 %v535_v23  ;;  %vm202_vm11 = vcmp.eq.s32.totalorder %v134_v21, %v3498_v29  ;;  %vm1328_vm10 = vcmask 1046532  }
  0xb7   :  { %v268_v31 = vpack.c.bf16 %v2796_v28, %v2795_v26  ;;  %v2813_v32 = vpack.c.bf16 %v2796_v28, %v2796_v28  ;;  %v551_v33 = vrot.slane %v537_v24, %v3503_v35  ;;  %v561_v34 = vrot.slane %v553_v25, %v3503_v35 }
  0xb8   :  { %v127_v37 = vpop.permute.xlu1 %126  ;;  %v138_v38 = vpop.permute.xlu0 %137  ;;  %v2798_v44 = vsel %vm202_vm11, 1.0, %v4682_v36  ;;  %vm1663_vm11 = vcmask 1041408  }
  0xb9   :  { %v389_v39 = vrot.slane %v268_v31, %v3503_v35  ;;  %v396_v40 = vrot.slane %v2813_v32, %v3503_v35  ;;  %vm201_vm12 = vcmp.eq.s32.totalorder %v127_v37, %v3498_v29  ;;  %vm203_vm13 = vcmp.eq.s32.totalorder %v138_v38, %v3498_v29 }
  0xba   :  { %v2797_v41 = vsel %vm201_vm12, 1.0, %v4682_v36  ;;  %v2799_v42 = vsel %vm203_vm13, 1.0, %v4682_v36  ;;  %v552_v43 = vcombine.low %v544_v30, %v551_v33  ;;  %vm1664_vm12 = vcmask 1045508  }
  0xbb   :  { %v397_v45 = vcombine.high %v389_v39, %v389_v39  ;;  %v554_v46 = vcombine.low %v381_v27, %v389_v39  ;;  %v269_v47 = vpack.c.bf16 %v2797_v41, %v2797_v41  ;;  %v398_v48 = vcombine.high %v396_v40, %v396_v40 }
  0xbc   :  { %v270_v49 = vpack.c.bf16 %v2799_v42, %v2798_v44  ;;  %v2814_v50 = vpack.c.bf16 %v2799_v42, %v2799_v42  ;;  %3121 = vmatprep.mubr.bf16.mxu0 %v552_v43  ;;  %v153_v51 = vpop.permute.xlu1 %152  ;;  %v149_v52 = vpop.permute.xlu0 %148  ;;  %vm1103_vm13 = vsmask.f32 3328 }
  0xbd   :  { %v570_v53 = vcombine.low %v397_v45, %v396_v40  ;;  %v405_v54 = vrot.slane %v269_v47, %v3503_v35  ;;  %vm206_vm14 = vcmp.eq.s32.totalorder %v153_v51, %v3498_v29  ;;  %vm205_vm15 = vcmp.eq.s32.totalorder %v149_v52, %v3498_v29 }
  0xbe   :  { %v413_v55 = vrot.slane %v270_v49, %v3503_v35  ;;  %v420_v56 = vrot.slane %v2814_v50, %v3503_v35  ;;  %v2802_v57 = vsel %vm206_vm14, 1.0, %v4682_v36  ;;  %v2801_v58 = vsel %vm205_vm15, 1.0, %v4682_v36  ;;  %vm3692_vm15 = vmor %vm1327_vm9, %vm1328_vm10 }
  0xbf   :  { %v571_v59 = vcombine.low %v398_v48, %v405_v54  ;;  %v2815_v60 = vpack.c.bf16 %v2802_v57, %v2802_v57  ;;  %v272_v61 = vpack.c.bf16 %v2802_v57, %v2801_v58  ;;  %v568_v62 = vrot.slane %v554_v46, %v3503_v35 }
  0xc0   :  { %v421_v63 = vcombine.high %v413_v55, %v413_v55  ;;  %v422_v0 = vcombine.high %v420_v56, %v420_v56  ;;  %v168_v1 = vpop.permute.xlu1 %167  ;;  %v164_v2 = vpop.permute.xlu0 %163  ;;  %v578_v3 = vrot.slane %v570_v53, %v3503_v35  ;;  %vm1104_vm14 = vsmask.f32 7440 }
  0xc1   :  { %v444_v4 = vrot.slane %v2815_v60, %v3503_v35  ;;  %v437_v5 = vrot.slane %v272_v61, %v3503_v35  ;;  %vm209_vm0 = vcmp.eq.s32.totalorder %v168_v1, %v3498_v29  ;;  %vm208_vm1 = vcmp.eq.s32.totalorder %v164_v2, %v3498_v29 }
  0xc2   :  { %v587_v6 = vcombine.low %v413_v55, %v421_v63  ;;  %v588_v7 = vcombine.low %v420_v56, %v422_v0  ;;  %v2805_v8 = vsel %vm209_vm0, 1.0, %v4682_v36  ;;  %v2804_v9 = vsel %vm208_vm1, 1.0, %v4682_v36  ;;  %vm3713_vm0 = vmor %vm1663_vm11, %vm1664_vm12 }
  0xc3   :  { %v445_v10 = vcombine.high %v437_v5, %v437_v5  ;;  %v2816_v11 = vpack.c.bf16 %v2805_v8, %v2805_v8  ;;  %v274_v12 = vpack.c.bf16 %v2805_v8, %v2804_v9  ;;  %v569_v13 = vcombine.low %v561_v34, %v568_v62  ;;  %v3296_v8 = vld [vmem:[%s4675_s2 + $0x8] sm:$0xff]   ;;  %v3297_v9 = vld [vmem:[%s4675_s2] sm:$0xff]   ;;  %vm3719_vm1 = vmor %vm1103_vm13, %vm1104_vm14 }
  0xc4   :  { %v157_v14 = vpop.permute.xlu1 %156  ;;  %v142_v15 = vpop.permute.xlu0 %141  ;;  %v585_v16 = vrot.slane %v571_v59, %v3503_v35  ;;  %v595_v17 = vrot.slane %v587_v6, %v3503_v35  ;;  %v602_v18 = vrot.slane %v588_v7, %v3503_v35  ;;  %v446_v30 = vcombine.high %v444_v4, %v444_v4  ;;  %3137 = vmatprep.subr.bf16.mxu1 %v3296_v8 }
  0xc5   :  { %v468_v19 = vrot.slane %v2816_v11, %v3503_v35  ;;  %v461_v20 = vrot.slane %v274_v12, %v3503_v35  ;;  %vm207_vm2 = vcmp.eq.s32.totalorder %v157_v14, %v3498_v29  ;;  %vm204_vm3 = vcmp.eq.s32.totalorder %v142_v15, %v3498_v29  ;;  %3122 = vmatmul.mubr.bf16.gmra.mxu0 %v569_v13  ;;  %v3621_v11 = vld [vmem:[%s4675_s2 + $0x38] sm:$0xff]  }
  0xc6   :  { %v2803_v21 = vsel %vm207_vm2, 1.0, %v4682_v36  ;;  %v2800_v22 = vsel %vm204_vm3, 1.0, %v4682_v36  ;;  %v586_v23 = vcombine.low %v578_v3, %v585_v16  ;;  %v603_v24 = vcombine.low %v595_v17, %v602_v18  ;;  %3138 = vmatpush3.bf16.msra.mxu1 %v3296_v8  ;;  %4741 = vst [vmem:[#allocation12_spill] sm:$0xff] %v3621_v11 }
  0xc7   :  { %v470_v25 = vcombine.high %v468_v19, %v468_v19  ;;  %v469_v26 = vcombine.high %v461_v20, %v461_v20  ;;  %v273_v27 = vpack.c.bf16 %v2803_v21, %v2803_v21  ;;  %v271_v28 = vpack.c.bf16 %v2800_v22, %v2800_v22  ;;  %3139 = vmatprep.subr.bf16.mxu1 %v3297_v9 }
  0xc8   :  { %3125 = vmatprep.mubr.bf16.mxu0 %v586_v23  ;;  %v183_v31 = vpop.permute.xlu1 %182  ;;  %v179_v32 = vpop.permute.xlu0 %178  ;;  %v605_v33 = vcombine.low %v445_v10, %v444_v4  ;;  %v3614_v10 = vld [vmem:[%s4675_s2 + $0x10] sm:$0xff]   ;;  %vm1471_vm2 = vsmask.f32 2304  ;;  %vm1472_vm3 = vsmask.f32 6416  ;;  %vm2668_vm9 = vcmask 1044484  }
  0xc9   :  { %v638_v34 = vcombine.low %v468_v19, %v470_v25  ;;  %v622_v37 = vcombine.low %v461_v20, %v469_v26  ;;  %v453_v38 = vrot.slane %v273_v27, %v3503_v35  ;;  %v429_v39 = vrot.slane %v271_v28, %v3503_v35 }
  0xca   :  { %vm212_vm4 = vcmp.eq.s32.totalorder %v183_v31, %v3498_v29  ;;  %vm211_vm5 = vcmp.eq.s32.totalorder %v179_v32, %v3498_v29  ;;  %v619_v40 = vrot.slane %v605_v33, %v3503_v35  ;;  %3140 = vmatpush3.bf16.msra.mxu1 %v3297_v9  ;;  %vm2671_vm10 = vcmask 1045509  }
  0xcb   :  { %v621_v41 = vcombine.low %v446_v30, %v453_v38  ;;  %v604_v42 = vcombine.low %v429_v39, %v437_v5  ;;  %v2808_v43 = vsel %vm212_vm4, 1.0, %v4682_v36  ;;  %v2807_v44 = vsel %vm211_vm5, 1.0, %v4682_v36  ;;  %vm3816_vm4 = vmor %vm1471_vm2, %vm1472_vm3 }
  0xcc   :  { %v2817_v45 = vpack.c.bf16 %v2808_v43, %v2808_v43  ;;  %v276_v46 = vpack.c.bf16 %v2808_v43, %v2807_v44  ;;  %v187_v47 = vpop.permute.xlu1 %186  ;;  %v172_v48 = vpop.permute.xlu0 %171  ;;  %v636_v49 = vrot.slane %v622_v37, %v3503_v35  ;;  %v646_v50 = vrot.slane %v638_v34, %v3503_v35 }
  0xcd   :  { %vm213_vm6 = vcmp.eq.s32.totalorder %v187_v47, %v3498_v29  ;;  %vm210_vm7 = vcmp.eq.s32.totalorder %v172_v48, %v3498_v29  ;;  %v612_v51 = vrot.slane %v604_v42, %v3503_v35  ;;  %v629_v52 = vrot.slane %v621_v41, %v3503_v35  ;;  %3126 = vmatmul.mubr.bf16.gmra.mxu0 %v603_v24 }
  0xce   :  { %v492_v53 = vrot.slane %v2817_v45, %v3503_v35  ;;  %v485_v54 = vrot.slane %v276_v46, %v3503_v35  ;;  %v2809_v55 = vsel %vm213_vm6, 1.0, %v4682_v36  ;;  %v2806_v56 = vsel %vm210_vm7, 1.0, %v4682_v36 }
  0xcf   :  { %v277_v57 = vpack.c.bf16 %v2809_v55, %v2809_v55  ;;  %v275_v58 = vpack.c.bf16 %v2806_v56, %v2806_v56  ;;  %v620_v59 = vcombine.low %v612_v51, %v619_v40  ;;  %v637_v60 = vcombine.low %v629_v52, %v636_v49 }
  0xd0   :  { %v494_v61 = vcombine.high %v492_v53, %v492_v53  ;;  %v493_v62 = vcombine.high %v485_v54, %v485_v54  ;;  %vm3411_vm5 = vmmov 0   ;;  %vm2659_vm6 = vcmask 1041409  }
  0xd1   :  { %v501_v29 = vrot.slane %v277_v57, %v3503_v35  ;;  %v477_v63 = vrot.slane %v275_v58, %v3503_v35  ;;  %3129 = vmatprep.mubr.bf16.mxu0 %v620_v59  ;;  %vm2662_vm7 = vcmask 1042434   ;;  %vm2674_vm11 = vcmask 1046534  }
  0xd2   :  { %v655_v0 = vcombine.low %v493_v62, %v492_v53  ;;  %vm2677_vm12 = vcmask 1047559  }
  0xd3   :  { %v656_v1 = vcombine.low %v494_v61, %v501_v29  ;;  %v639_v2 = vcombine.low %v477_v63, %v485_v54 }
  0xd4   :  { %v663_v3 = vrot.slane %v655_v0, %v3503_v35 }
  0xd5   :  { %v653_v4 = vrot.slane %v639_v2, %v3503_v35  ;;  %v670_v5 = vrot.slane %v656_v1, %v3503_v35  ;;  %3130 = vmatmul.mubr.bf16.gmra.mxu0 %v637_v60  ;;  %v3606_v35 = vld [vmem:[%s4675_s2 + $0x18] sm:$0xff]  }
  0xd6   :  { %3209 = vmatprep.subr.bf16.mxu0 %v3606_v35  ;;  %3149 = vmatprep.subr.bf16.mxu1 %v3606_v35 }
  0xd7   :  { %v654_v6 = vcombine.low %v646_v50, %v653_v4  ;;  %v671_v7 = vcombine.low %v663_v3, %v670_v5  ;;  %3210 = vmatpush3.bf16.msra.mxu0 %v3606_v35 }
  0xd8   :  { %3211 = vmatprep.subr.bf16.mxu0 %v3614_v10 }
  0xd9   :  { %3133 = vmatprep.mubr.bf16.mxu0 %v654_v6 }
  0xdb   :  { %3212 = vmatpush3.bf16.msra.mxu0 %v3614_v10 }
  0xdc   :  { %3233 = vmatprep.subr.bf16.mxu0 %v3621_v11 }
  0xdd   :  { %3134 = vmatmul.mubr.bf16.gmra.mxu0 %v671_v7 }
 0x176   :  { %v3119_v12 = vpop.f32.mrf.mxu0 }
 0x177   :  { %v865_v14 = vcombine.high %v3119_v12, %v3119_v12  ;;  %v3624_v21 = vpack.c.bf16 %v3119_v12, %v3119_v12 }
 0x178   :  { %v764_v13 = vpop.f32.mrf.mxu0 }
 0x179   :  { %v863_v15 = vcombine.high %v764_v13, %v764_v13  ;;  %4742 = vst [vmem:[#allocation13_spill] sm:$0xff] %v3624_v21  ;;  %v2259_v25 = vshrl.u32 %v3624_v21, 16  ;;  %v1980_v26 = vshll.u32 %v3624_v21, 16 }
 0x17a   :  { %v3120_v16 = vpop.f32.mrf.mxu0 }
 0x17b   :  { %v887_v17 = vcombine.low %v764_v13, %v863_v15  ;;  %v889_v18 = vcombine.low %v865_v14, %v3120_v16  ;;  %v866_v32 = vcombine.high %v3120_v16, %v3120_v16  ;;  %v3639_v39 = vrot.slane %v2259_v25, 5 }
 0x17c   :  { %v767_v19 = vpop.f32.mrf.mxu0  ;;  %v3641_v40 = vrot.slane %v1980_v26, 6  ;;  %v3667_v61 = vrot.slane %v1980_v26, 5 }
 0x17d   :  { %v2982_v20 = vpack.c.bf16 %v889_v18, %v887_v17  ;;  %v864_v22 = vcombine.high %v767_v19, %v767_v19  ;;  %v3627_v23 = vpack.c.bf16 %v887_v17, %v887_v17  ;;  %v3629_v24 = vpack.c.bf16 %v889_v18, %v889_v18 }
 0x17f   :  { %3141 = vmatprep.mubr.msk.bf16.mxu1 %vm993_vm8, %v2982_v20  ;;  %4743 = vst [vmem:[#allocation14_spill] sm:$0xff] %v3627_v23  ;;  %4744 = vst [vmem:[#allocation15_spill] sm:$0xff] %v3629_v24  ;;  %v3633_v27 = vcombine.low %v767_v19, %v864_v22  ;;  %v1107_v30 = vshrl.u32 %v3627_v23, 16  ;;  %v1110_v31 = vshll.u32 %v3627_v23, 16  ;;  %v1121_v33 = vshrl.u32 %v3629_v24, 16 }
 0x180   :  { %v1124_v34 = vshll.u32 %v3629_v24, 16  ;;  %v2878_v0 = vrot.slane %v3627_v23, 9 }
 0x181   :  { %4745 = vst [vmem:[#allocation16_spill] sm:$0xff] %v3633_v27  ;;  %v3645_v41 = vpack.c.bf16 %v3633_v27, %v3633_v27  ;;  %v1109_v45 = vrot.slane %v1107_v30, 4  ;;  %v1112_v46 = vrot.slane %v1110_v31, 5  ;;  %v1474_v47 = vrot.slane %v1107_v30, 5 }
 0x182   :  { %v1475_v48 = vrot.slane %v1110_v31, 6  ;;  %v1123_v49 = vrot.slane %v1121_v33, 4  ;;  %v1126_v50 = vrot.slane %v1124_v34, 5  ;;  %v3657_v54 = vrot.slane %v1121_v33, 5 }
 0x183   :  { %4746 = vst [vmem:[#allocation17_spill] sm:$0xff] %v3645_v41  ;;  %v3659_v55 = vrot.slane %v1124_v34, 6  ;;  %v1116_v57 = vshll.u32 %v3645_v41, 16  ;;  %v1478_v58 = vshrl.u32 %v3645_v41, 16  ;;  %v1113_v63 = vor.u32 %v1112_v46, %v1109_v45 }
 0x184   :  { %4749 = vst [vmem:[#allocation20_spill] sm:$0xff] %v3657_v54  ;;  %v1127_v2 = vor.u32 %v1126_v50, %v1123_v49  ;;  %v1476_v3 = vor.u32 %v1475_v48, %v1474_v47  ;;  %v4681_v9 = vrot.slane %v3645_v41, 5  ;;  %v4755_v33 = vmov 0 }
 0x185   :  { %v3123_v28 = vpop.f32.mrf.mxu0  ;;  %4750 = vst [vmem:[#allocation21_spill] sm:$0xff] %v3659_v55  ;;  %v3680_v8 = vrot.slane %v1116_v57, 5  ;;  %v3683_v12 = vrot.slane %v1478_v58, 4  ;;  %v3696_v19 = vrot.slane %v1113_v63, 4  ;;  %v3705_v30 = vrot.slane %v1116_v57, 6 }
 0x186   :  { %v869_v37 = vcombine.high %v3123_v28, %v3123_v28  ;;  %v3699_v25 = vrot.slane %v1127_v2, 4  ;;  %v3701_v26 = vrot.slane %v1476_v3, 4  ;;  %v4756_v33 = vsel %vm3713_vm0, 4294967295, %v4755_v33 }
 0x187   :  { %v780_v38 = vpop.f32.mrf.mxu0  ;;  %4757 = vst [vmem:[#allocation24_spill] sm:$0xff] %v4756_v33  ;;  %v3735_v46 = vsel %vm3692_vm15, %v2878_v0, %v4681_v9 }
 0x188   :  { %v3647_v42 = vcombine.low %v3123_v28, %v869_v37  ;;  %v3649_v43 = vcombine.low %v866_v32, %v780_v38  ;;  %v867_v20 = vcombine.high %v780_v38, %v780_v38  ;;  %4753 = vst [vmem:[#allocation22_spill] sm:$0xff] %v3701_v26  ;;  %v3703_v28 = vrot.slane %v1478_v58, 5  ;;  %4761 = vst [vmem:[#allocation26_spill] sm:$0xff] %v3735_v46 }
 0x189   :  { %v3124_v44 = vpop.f32.mrf.mxu0 }
 0x18a   :  { %4747 = vst [vmem:[#allocation18_spill] sm:$0xff] %v3647_v42  ;;  %4748 = vst [vmem:[#allocation19_spill] sm:$0xff] %v3649_v43  ;;  %v3653_v51 = vpack.c.bf16 %v3647_v42, %v3647_v42  ;;  %v3673_v1 = vpack.c.bf16 %v3124_v44, %v3124_v44  ;;  %v3709_v31 = vpack.c.bf16 %v3649_v43, %v3649_v43 }
 0x18b   :  { %v783_v53 = vpop.f32.mrf.mxu0  ;;  %v870_v32 = vcombine.high %v3124_v44, %v3124_v44  ;;  %v3740_v63 = vpack.c.bf16 %v867_v20, %v867_v20 }
 0x18c   :  { %v4684_v59 = vrot.slane %v3653_v51, 6  ;;  %v1144_v16 = vshll.u32 %v3653_v51, 16  ;;  %v1498_v17 = vshrl.u32 %v3653_v51, 16  ;;  %v2418_v22 = vrot.slane %v3673_v1, 6  ;;  %4754 = vst [vmem:[#allocation23_spill] sm:$0xff] %v3709_v31 }
 0x18d   :  { %v3665_v60 = vpop.f32.mrf.mxu0  ;;  %v868_v38 = vcombine.high %v783_v53, %v783_v53  ;;  %v4685_v48 = vrot.slane %v3653_v51, 5  ;;  %4762 = vst [vmem:[#allocation27_spill] sm:$0xff] %v3740_v63  ;;  %v1130_v3 = vshll.u32 %v3709_v31, 16  ;;  %v1996_v0 = vshll.u32 %v3673_v1, 16 }
 0x18e   :  { %v2417_v13 = vrot.slane %v4684_v59, 4  ;;  %v3737_v47 = vrot.slane %v1144_v16, 5  ;;  %v1992_v49 = vrot.slane %v1498_v17, 4  ;;  %v1500_v57 = vrot.slane %v1498_v17, 5 }
 0x18f   :  { %v796_v14 = vpop.f32.mrf.mxu0  ;;  %v1501_v58 = vrot.slane %v1144_v16, 6  ;;  %v891_v2 = vcombine.low %v783_v53, %v868_v38  ;;  %v2144_v16 = vrot.slane %v3673_v1, 5  ;;  %v2273_v17 = vshrl.u32 %v3673_v1, 16 }
 0x190   :  { %v3725_v37 = vsel %vm3713_vm0, %v2417_v13, %v2418_v22  ;;  %v893_v50 = vcombine.low %v870_v32, %v796_v14  ;;  %v1488_v13 = vshrl.u32 %v3709_v31, 16  ;;  %v1993_v53 = vor.u32 %v1992_v49, %v3737_v47 }
 0x191   :  { %4760 = vst [vmem:[#allocation25_spill] sm:$0xff] %v3725_v37  ;;  %v3727_v45 = vpop.f32.mrf.mxu0  ;;  %v2143_v38 = vrot.slane %v4685_v48, 4  ;;  %v873_v56 = vcombine.high %v3665_v60, %v3665_v60  ;;  %v3758_v9 = vor.u32 %v1501_v58, %v1500_v57  ;;  %v1988_v6 = vshll.u32 %v3740_v63, 16 }
 0x192   :  { %v2983_v20 = vpack.c.bf16 %v893_v50, %v891_v2  ;;  %v2266_v4 = vshrl.u32 %v3740_v63, 16  ;;  %v871_v15 = vcombine.high %v796_v14, %v796_v14  ;;  %v3763_v1 = vrot.slane %v1130_v3, 5  ;;  %v3780_v14 = vld [vmem:[%s4675_s2 + $0x28] sm:$0xff]  }
 0x193   :  { %v799_v52 = vpop.f32.mrf.mxu0  ;;  %4763 = vst [vmem:[#allocation28_spill] sm:$0xff] %v3758_v9  ;;  %v3765_v49 = vrot.slane %v1488_v13, 5  ;;  %v3767_v7 = vrot.slane %v1130_v3, 6  ;;  %v2990_v5 = vpack.c.bf16 %v891_v2, %v891_v2  ;;  %v3770_v29 = vrot.slane %v1488_v13, 4 }
 0x194   :  { %3142 = vmatmul.mubr.msk.bf16.vlgmr.msra.gmra.mxu1 %vm993_vm8, %v2983_v20  ;;  %v2275_v57 = vrot.slane %v2273_v17, 5  ;;  %v2276_v58 = vrot.slane %v1996_v0, 6  ;;  %v3772_v32 = vcombine.low %v871_v15, %v799_v52  ;;  %v3782_v3 = vrot.slane %v1993_v53, 4 }
 0x195   :  { %3150 = vmatpush3.bf16.msra.mxu1 %v3606_v35  ;;  %v3774_v62 = vpop.f32.mrf.mxu0  ;;  %v3787_v13 = vcombine.low %v3665_v60, %v873_v56  ;;  %v2272_v15 = vrot.slane %v3758_v9, 4  ;;  %v3790_v17 = vrot.slane %v2266_v4, 5  ;;  %v3792_v20 = vrot.slane %v1988_v6, 6 }
 0x196   :  { %4764 = vst [vmem:[#allocation29_spill] sm:$0xff] %v3772_v32  ;;  %3151 = vmatprep.subr.bf16.mxu1 %v3614_v10  ;;  %v3794_v36 = vrot.slane %v1996_v0, 5  ;;  %v3796_v22 = vrot.slane %v1988_v6, 5  ;;  %v3800_v53 = vsel %vm3692_vm15, %v2143_v38, %v2144_v16  ;;  %v1135_v2 = vshrl.u32 %v2990_v5, 16 }
 0x197   :  { %4765 = vst [vmem:[#allocation30_spill] sm:$0xff] %v3800_v53  ;;  %v1138_v44 = vshll.u32 %v2990_v5, 16  ;;  %v2277_v56 = vor.u32 %v2276_v58, %v2275_v57  ;;  %v3803_v60 = vpack.c.bf16 %v893_v50, %v893_v50  ;;  %v874_v4 = vcombine.high %v3727_v45, %v3727_v45  ;;  %v3811_v6 = vpop.f32.mrf.mxu0 }
 0x198   :  { %v3809_v0 = vpack.c.bf16 %v3772_v32, %v3772_v32  ;;  %v2880_v50 = vrot.slane %v2990_v5, 9  ;;  %v3826_v38 = vpack.c.bf16 %v3787_v13, %v3787_v13  ;;  %v872_v59 = vcombine.high %v799_v52, %v799_v52 }
 0x199   :  { %3152 = vmatpush3.bf16.msra.mxu1 %v3614_v10  ;;  %v3834_v35 = vsel %vm3816_vm4, %v2272_v15, %v2277_v56  ;;  %v3838_v48 = vcombine.high %v3774_v62, %v3774_v62  ;;  %v1137_v10 = vrot.slane %v1135_v2, 4  ;;  %v1140_v27 = vrot.slane %v1138_v44, 5  ;;  %v3847_v15 = vpop.f32.mrf.mxu0 }
 0x19a   :  { %3161 = vmatprep.subr.bf16.mxu1 %v3780_v14  ;;  %4768 = vst [vmem:[#allocation31_spill] sm:$0xff] %v3826_v38  ;;  %4769 = vst [vmem:[#allocation32_spill] sm:$0xff] %v3834_v35  ;;  %v2908_v43 = vrot.slane %v2990_v5, 10  ;;  %v1149_v63 = vshrl.u32 %v3803_v60, 16  ;;  %v1152_v57 = vshll.u32 %v3803_v60, 16  ;;  %v3845_v42 = vcombine.low %v3727_v45, %v874_v4 }
 0x19b   :  { %v4771_v52 = vrot.slane %v3653_v51, 5  ;;  %v1163_v5 = vshrl.u32 %v3826_v38, 16  ;;  %v1166_v9 = vshll.u32 %v3826_v38, 16  ;;  %v2909_v21 = vrot.slane %v3803_v60, 10 }
 0x19c   :  { %4770 = vst [vmem:[#allocation33_spill] sm:$0xff] %v3845_v42  ;;  %v1680_v58 = vrot.slane %v3809_v0, 6  ;;  %v3860_v45 = vpack.c.bf16 %v872_v59, %v872_v59  ;;  %v4773_v4 = vrot.slane %v3809_v0, 5  ;;  %v1141_v41 = vor.u32 %v1140_v27, %v1137_v10 }
 0x19d   :  { %v3853_v56 = vsel %vm3692_vm15, %v2880_v50, %v4771_v52  ;;  %v3864_v26 = vrot.slane %v1135_v2, 5  ;;  %v3866_v50 = vrot.slane %v1138_v44, 6  ;;  %v4776_v52 = vrot.slane %v3653_v51, 6 }
 0x19e   :  { %4772 = vst [vmem:[#allocation34_spill] sm:$0xff] %v3853_v56  ;;  %v2146_v23 = vrot.slane %v4773_v4, 4  ;;  %v1151_v32 = vrot.slane %v1149_v63, 4  ;;  %v1154_v38 = vrot.slane %v1152_v57, 5  ;;  %v3876_v59 = vsel %vm3713_vm0, %v2909_v21, %v1680_v58  ;;  %v815_v4 = vpop.f32.mrf.mxu0 }
 0x19f   :  { %4774 = vst [vmem:[#allocation35_spill] sm:$0xff] %v3864_v26  ;;  %4775 = vst [vmem:[#allocation36_spill] sm:$0xff] %v3866_v50  ;;  %v3872_v54 = vsel %vm3713_vm0, %v2908_v43, %v4776_v52  ;;  %v2147_v55 = vrot.slane %v3860_v45, 5  ;;  %v1158_v27 = vshll.u32 %v3809_v0, 16  ;;  %v1508_v44 = vshrl.u32 %v3809_v0, 16 }
 0x1a0   :  { %4777 = vst [vmem:[#allocation37_spill] sm:$0xff] %v3872_v54  ;;  %4778 = vst [vmem:[#allocation38_spill] sm:$0xff] %v3876_v59  ;;  %v2420_v2 = vrot.slane %v1680_v58, 4  ;;  %v3883_v10 = vrot.slane %v1149_v63, 5  ;;  %v3885_v43 = vrot.slane %v1152_v57, 6  ;;  %v3889_v52 = vpack.c.bf16 %v3845_v42, %v3845_v42 }
 0x1a1   :  { %v3893_v21 = vsel %vm3692_vm15, %v2146_v23, %v2147_v55  ;;  %v3895_v35 = vrot.slane %v1163_v5, 4  ;;  %v3897_v46 = vrot.slane %v1166_v9, 5  ;;  %v2421_v63 = vrot.slane %v3860_v45, 6  ;;  %v3910_v23 = vpop.f32.mrf.mxu0 }
 0x1a2   :  { %4779 = vst [vmem:[#allocation39_spill] sm:$0xff] %v3883_v10  ;;  %4780 = vst [vmem:[#allocation40_spill] sm:$0xff] %v3885_v43  ;;  %v3902_v58 = vrot.slane %v1141_v41, 4  ;;  %v3906_v59 = vrot.slane %v1163_v5, 5  ;;  %v3908_v54 = vrot.slane %v1166_v9, 6  ;;  %v1155_v55 = vor.u32 %v1154_v38, %v1151_v32 }
 0x1a3   :  { %4781 = vst [vmem:[#allocation41_spill] sm:$0xff] %v3889_v52  ;;  %4782 = vst [vmem:[#allocation42_spill] sm:$0xff] %v3893_v21  ;;  %v3912_v24 = vrot.slane %v1158_v27, 5  ;;  %v2000_v31 = vrot.slane %v1508_v44, 4  ;;  %v3916_v51 = vsel %vm3713_vm0, %v2420_v2, %v2421_v63  ;;  %v1172_v21 = vshll.u32 %v3889_v52, 16  ;;  %v828_v5 = vpop.f32.mrf.mxu0 }
 0x1a4   :  { %4783 = vst [vmem:[#allocation43_spill] sm:$0xff] %v3906_v59  ;;  %4784 = vst [vmem:[#allocation44_spill] sm:$0xff] %v3908_v54  ;;  %v4786_v9 = vor.u32 %v3683_v12, %v3680_v8  ;;  %v1518_v38 = vshrl.u32 %v3889_v52, 16  ;;  %v1985_v2 = vor.u32 %v3770_v29, %v3763_v1  ;;  %v875_v63 = vcombine.high %v3811_v6, %v3811_v6 }
 0x1a5   :  { %4785 = vst [vmem:[#allocation45_spill] sm:$0xff] %v3916_v51  ;;  %v1510_v53 = vrot.slane %v1508_v44, 5  ;;  %v1511_v10 = vrot.slane %v1158_v27, 6  ;;  %v876_v43 = vcombine.high %v815_v4, %v815_v4  ;;  %v2001_v51 = vor.u32 %v2000_v31, %v3912_v24 }
 0x1a6   :  { %v1978_v57 = vrot.slane %v4786_v9, 4  ;;  %v1986_v12 = vrot.slane %v1985_v2, 4  ;;  %v878_v9 = vcombine.high %v3847_v15, %v3847_v15  ;;  %v897_v32 = vcombine.low %v875_v63, %v815_v4 }
 0x1a7   :  { %v3936_v37 = vrot.slane %v1155_v55, 4  ;;  %v2004_v29 = vshll.u32 %v3860_v45, 16  ;;  %v2280_v26 = vshrl.u32 %v3860_v45, 16  ;;  %v3947_v31 = vcombine.low %v876_v43, %v3774_v62 }
 0x1a8   :  { %v1983_v44 = vsel %vm3719_vm1, %v1978_v57, %v3667_v61  ;;  %v1991_v27 = vsel %vm3719_vm1, %v1986_v12, %v3796_v22  ;;  %v2984_v2 = vpack.c.bf16 %v897_v32, %v3787_v13  ;;  %v879_v4 = vcombine.high %v828_v5, %v828_v5 }
 0x1a9   :  { %4787 = vst [vmem:[#allocation46_spill] sm:$0xff] %v3947_v31  ;;  %v3950_v55 = vrot.slane %v1172_v21, 5  ;;  %v4788_v63 = vrot.slane %v3809_v0, 5  ;;  %v4789_v45 = vrot.slane %v3803_v60, 9  ;;  %v3962_v61 = vpack.c.bf16 %v3838_v48, %v3838_v48  ;;  %v3136_v60 = vpop.f32.mrf.mxu0 }
 0x1aa   :  { %v2940_v22 = vcombine.low %v1983_v44, %v1991_v27  ;;  %v3964_v62 = vor.u32 %v1511_v10, %v1510_v53  ;;  %v2002_v43 = vrot.slane %v2001_v51, 4  ;;  %v3967_v13 = vcombine.low %v3847_v15, %v878_v9  ;;  %3145 = vmatprep.mubr.msk.bf16.mxu1 %vm993_vm8, %v2984_v2 }
 0x1ab   :  { %v3958_v41 = vsel %vm3692_vm15, %v4789_v45, %v4788_v63  ;;  %v3972_v57 = vrot.slane %v2280_v26, 5  ;;  %v3974_v12 = vrot.slane %v2004_v29, 6  ;;  %v3979_v48 = vpack.c.bf16 %v3811_v6, %v3811_v6 }
 0x1ac   :  { %4790 = vst [vmem:[#allocation47_spill] sm:$0xff] %v3958_v41  ;;  %3213 = vmatprep.mubr.msk.bf16.mxu0 %vm993_vm8, %v2940_v22  ;;  %v881_v53 = vcombine.high %v3910_v23, %v3910_v23  ;;  %v3983_v15 = vrot.slane %v1518_v38, 5  ;;  %v3985_v51 = vrot.slane %v1172_v21, 6  ;;  %v2006_v10 = vrot.slane %v2004_v29, 5 }
 0x1ad   :  { %4791 = vst [vmem:[#allocation48_spill] sm:$0xff] %v3979_v48  ;;  %v3987_v9 = vcombine.low %v828_v5, %v879_v4  ;;  %v3989_v26 = vrot.slane %v1518_v38, 4  ;;  %v2020_v21 = vshll.u32 %v3962_v61, 16  ;;  %v4004_v5 = vpack.c.bf16 %v3967_v13, %v3967_v13  ;;  %v4037_v4 = vld [vmem:[%s4675_s2 + $0x30] sm:$0xff]  }
 0x1ae   :  { %v3997_v27 = vcombine.low %v881_v53, %v3136_v60  ;;  %v2007_v2 = vsel %vm3719_vm1, %v2002_v43, %v2006_v10  ;;  %v4006_v38 = vpack.c.bf16 %v897_v32, %v897_v32  ;;  %v2294_v63 = vshrl.u32 %v3962_v61, 16 }
 0x1af   :  { %4792 = vst [vmem:[#allocation49_spill] sm:$0xff] %v3987_v9  ;;  %4794 = vst [vmem:[#allocation51_spill] sm:$0xff] %v4004_v5  ;;  %v2012_v45 = vshll.u32 %v3979_v48, 16  ;;  %v2287_v43 = vshrl.u32 %v3979_v48, 16  ;;  %v4017_v53 = vpack.c.bf16 %v3947_v31, %v3947_v31  ;;  %v4021_v32 = vpack.c.bf16 %v3987_v9, %v3987_v9 }
 0x1b0   :  { %4793 = vst [vmem:[#allocation50_spill] sm:$0xff] %v3997_v27  ;;  %4795 = vst [vmem:[#allocation52_spill] sm:$0xff] %v4006_v38  ;;  %v882_v10 = vcombine.high %v3136_v60, %v3136_v60  ;;  %v4025_v0 = vpack.c.bf16 %v3997_v27, %v3997_v27  ;;  %v4799_v22 = vsel %vm3719_vm1, %v3782_v3, %v3794_v36  ;;  %v4039_v44 = vrot.slane %v2020_v21, 5  ;;  %v831_v60 = vpop.f32.mrf.mxu0 }
 0x1b1   :  { %4796 = vst [vmem:[#allocation53_spill] sm:$0xff] %v4017_v53  ;;  %4797 = vst [vmem:[#allocation54_spill] sm:$0xff] %v4021_v32  ;;  %v2941_v29 = vcombine.low %v4799_v22, %v2007_v2  ;;  %v4044_v6 = vrot.slane %v2294_v63, 5  ;;  %v4046_v9 = vrot.slane %v2020_v21, 6  ;;  %v4048_v27 = vrot.slane %v2012_v45, 5 }
 0x1b2   :  { %4798 = vst [vmem:[#allocation55_spill] sm:$0xff] %v4025_v0  ;;  %v4052_v3 = vrot.slane %v2287_v43, 5  ;;  %v1200_v2 = vshll.u32 %v4021_v32, 16  ;;  %v1538_v22 = vshrl.u32 %v4021_v32, 16  ;;  %v1214_v42 = vshll.u32 %v4025_v0, 16 }
 0x1b3   :  { %3214 = vmatmul.mubr.msk.bf16.vlgmr.msra.gmra.mxu0 %vm993_vm8, %v2941_v29  ;;  %v4058_v63 = vrot.slane %v2012_v45, 6  ;;  %v1186_v21 = vshll.u32 %v4017_v53, 16  ;;  %v1548_v31 = vshrl.u32 %v4025_v0, 16  ;;  %v4062_v36 = vpack.c.bf16 %v882_v10, %v882_v10 }
 0x1b4   :  { %4800 = vst [vmem:[#allocation56_spill] sm:$0xff] %v4052_v3  ;;  %3234 = vmatpush3.bf16.msra.mxu0 %v3621_v11  ;;  %v4802_v29 = vshrl.u32 %v4004_v5, 16  ;;  %v4803_v50 = vshll.u32 %v4004_v5, 16  ;;  %v4804_v59 = vshrl.u32 %v4006_v38, 16  ;;  %v1528_v41 = vshrl.u32 %v4017_v53, 16 }
 0x1b5   :  { %4801 = vst [vmem:[#allocation57_spill] sm:$0xff] %v4058_v63  ;;  %3235 = vmatprep.subr.bf16.mxu0 %v4037_v4  ;;  %v4805_v56 = vshll.u32 %v4006_v38, 16  ;;  %v880_v10 = vcombine.high %v831_v60, %v831_v60  ;;  %v4078_v0 = vpack.c.bf16 %v831_v60, %v831_v60  ;;  %v4084_v32 = vrot.slane %v1200_v2, 5 }
 0x1b6   :  { %v4067_v43 = vrot.slane %v4802_v29, 4  ;;  %v4071_v54 = vrot.slane %v4803_v50, 5  ;;  %v1179_v45 = vrot.slane %v4804_v59, 4  ;;  %v1133_v29 = vsel %vm3719_vm1, %v3699_v25, %v3763_v1 }
 0x1b7   :  { %v1182_v52 = vrot.slane %v4805_v56, 5  ;;  %v2024_v50 = vrot.slane %v1538_v22, 4  ;;  %v4086_v33 = vrot.slane %v1214_v42, 5  ;;  %v4806_v59 = vsel %vm3719_vm1, %v3696_v19, %v3680_v8 }
 0x1b8   :  { %v2868_v38 = vcombine.low %v4806_v59, %v1133_v29  ;;  %3236 = vmatpush3.bf16.msra.mxu0 %v4037_v4  ;;  %v2032_v56 = vrot.slane %v1548_v31, 4  ;;  %v4740_v60 = vshll.u32 %v4062_v36, 16  ;;  %v901_v53 = vcombine.low %v880_v10, %v3910_v23 }
 0x1b9   :  { %v4807_v1 = vmov 0.0   ;;  %v1530_v5 = vrot.slane %v1528_v41, 5  ;;  %v1531_v11 = vrot.slane %v1186_v21, 6  ;;  %v1188_v48 = vrot.slane %v1186_v21, 5 }
 0x1ba   :  { %3257 = vmatprep.subr.bf16.mxu0 %v4807_v1  ;;  %v2009_v63 = vor.u32 %v3989_v26, %v3950_v55  ;;  %v4100_v3 = vrot.slane %v1538_v22, 5  ;;  %v4102_v8 = vrot.slane %v1200_v2, 6  ;;  %v2985_v19 = vpack.c.bf16 %v901_v53, %v3967_v13 }
 0x1bb   :  { %v4105_v29 = vpack.c.bf16 %v901_v53, %v901_v53  ;;  %v4107_v59 = vrot.slane %v1548_v31, 5  ;;  %v4109_v23 = vrot.slane %v1214_v42, 6  ;;  %v2016_v10 = vrot.slane %v1528_v41, 4 }
 0x1bc   :  { %v2025_v25 = vor.u32 %v2024_v50, %v4084_v32  ;;  %v2038_v21 = vrot.slane %v4740_v60, 5  ;;  %v4808_v26 = vshll.u32 %v4078_v0, 16  ;;  %3146 = vmatmul.mubr.msk.bf16.gmra.mxu1 %vm993_vm8, %v2985_v19  ;;  %v2010_v2 = vrot.slane %v2009_v63, 4 }
 0x1bd   :  { %v2033_v13 = vor.u32 %v2032_v56, %v4086_v33  ;;  %v1205_v53 = vshrl.u32 %v4105_v29, 16  ;;  %v1208_v31 = vshll.u32 %v4105_v29, 16  ;;  %3153 = vmatprep.mubr.msk.bf16.mxu1 %vm993_vm8, %v2868_v38  ;;  %v2017_v42 = vor.u32 %v2016_v10, %v1188_v48 }
 0x1be   :  { %v2030_v22 = vrot.slane %v4808_v26, 5  ;;  %v2026_v41 = vrot.slane %v2025_v25, 4  ;;  %v1147_v60 = vsel %vm3719_vm1, %v3902_v58, %v3737_v47  ;;  %v4127_v19 = vor.u32 %v3705_v30, %v3703_v28 }
 0x1bf   :  { %v2034_v50 = vrot.slane %v2033_v13, 4  ;;  %v4131_v63 = vor.u32 %v3767_v7, %v3765_v49  ;;  %v2018_v56 = vrot.slane %v2017_v42, 4  ;;  %v1169_v25 = vor.u32 %v3897_v46, %v3895_v35  ;;  %v4812_v13 = vld [vmem:[#allocation23_spill] sm:$0xff] }
 0x1c0   :  { %v2031_v38 = vsel %vm3719_vm1, %v2026_v41, %v2030_v22  ;;  %v1183_v10 = vor.u32 %v1182_v52, %v1179_v45  ;;  %v2015_v47 = vsel %vm3719_vm1, %v2010_v2, %v4048_v27  ;;  %v2258_v30 = vrot.slane %v4127_v19, 4  ;;  %v4814_v41 = vld [vmem:[#allocation15_spill] sm:$0xff] }
 0x1c1   :  { %v2039_v28 = vsel %vm3719_vm1, %v2034_v50, %v2038_v21  ;;  %v2265_v7 = vrot.slane %v4131_v63, 4  ;;  %v2023_v49 = vsel %vm3719_vm1, %v2018_v56, %v4039_v44  ;;  %v1170_v26 = vrot.slane %v1169_v25, 4 }
 0x1c2   :  { %v2943_v58 = vcombine.low %v2031_v38, %v2039_v28  ;;  %v1184_v22 = vrot.slane %v1183_v10, 4  ;;  %v2942_v46 = vcombine.low %v2015_v47, %v2023_v49  ;;  %v4809_v35 = vsel %vm3719_vm1, %v3936_v37, %v3912_v24  ;;  %v4819_v28 = vld [vmem:[#allocation56_spill] sm:$0xff] }
 0x1c3   :  { %v2869_v52 = vcombine.low %v1147_v60, %v4809_v35  ;;  %v4810_v27 = vor.u32 %v3641_v40, %v3639_v39  ;;  %v4811_v21 = vor.u32 %v3792_v20, %v3790_v17  ;;  %v1175_v2 = vsel %vm3719_vm1, %v1170_v26, %v3950_v55  ;;  %v4170_v39 = vld [vmem:[%s4675_s2 + $0x20] sm:$0xff]  }
 0x1c4   :  { %v1189_v24 = vsel %vm3719_vm1, %v1184_v22, %v1188_v48  ;;  %v1197_v40 = vor.u32 %v4071_v54, %v4067_v43  ;;  %v1207_v37 = vrot.slane %v1205_v53, 4  ;;  %3217 = vmatprep.mubr.msk.bf16.mxu0 %vm993_vm8, %v2942_v46  ;;  %v1210_v55 = vrot.slane %v1208_v31, 5 }
 0x1c5   :  { %v2264_v45 = vsel %vm3816_vm4, %v2258_v30, %v4810_v27  ;;  %v2271_v44 = vsel %vm3816_vm4, %v2265_v7, %v4811_v21  ;;  %3154 = vmatmul.mubr.msk.bf16.vlgmr.msra.gmra.mxu1 %vm993_vm8, %v2869_v52  ;;  %v2870_v20 = vcombine.low %v1175_v2, %v1189_v24  ;;  %v4182_v48 = vor.u32 %v3985_v51, %v3983_v15  ;;  %v4820_v30 = vld [vmem:[#allocation57_spill] sm:$0xff] }
 0x1c6   :  { %v2956_v17 = vcombine.low %v2264_v45, %v2271_v44  ;;  %v2427_v60 = vrot.slane %v3962_v61, 6  ;;  %v2308_v54 = vshrl.u32 %v4062_v36, 16  ;;  %3218 = vmatmul.mubr.msk.bf16.gmra.mxu0 %vm993_vm8, %v2943_v58  ;;  %3162 = vmatpush3.bf16.msra.mxu1 %v3780_v14  ;;  %v4188_v43 = vor.u32 %v1531_v11, %v1530_v5  ;;  %v4818_v5 = vld [vmem:[#allocation26_spill] sm:$0xff]  ;;  %v4825_v44 = vld [vmem:[#allocation32_spill] sm:$0xff] }
 0x1c7   :  { %v4813_v42 = vrot.slane %v4812_v13, 5  ;;  %v4815_v50 = vrot.slane %v4814_v41, 9  ;;  %v4816_v15 = vor.u32 %v3974_v12, %v3972_v57  ;;  %v4817_v51 = vrot.slane %v3964_v62, 4  ;;  %3157 = vmatprep.mubr.msk.bf16.mxu1 %vm993_vm8, %v2870_v20  ;;  %3163 = vmatprep.subr.bf16.mxu1 %v4170_v39 }
 0x1c8   :  { %v2301_v25 = vshrl.u32 %v4078_v0, 16  ;;  %3237 = vmatprep.mubr.msk.bf16.mxu0 %vm993_vm8, %v2956_v17  ;;  %v1211_v11 = vor.u32 %v1210_v55, %v1207_v37  ;;  %v2298_v47 = vor.u32 %v4046_v9, %v4044_v6  ;;  %v2291_v57 = vor.u32 %v4820_v30, %v4819_v28  ;;  %v4821_v9 = vld [vmem:[#allocation48_spill] sm:$0xff]  ;;  %v4826_v37 = vld [vmem:[#allocation21_spill] sm:$0xff] }
 0x1c9   :  { %v1337_v56 = vsel %vm3692_vm15, %v4815_v50, %v4813_v42  ;;  %v2285_v38 = vsel %vm3816_vm4, %v4817_v51, %v4816_v15  ;;  %v2286_v12 = vrot.slane %v4182_v48, 4  ;;  %v2293_v7 = vrot.slane %v4188_v43, 4  ;;  %v4827_v17 = vld [vmem:[#allocation20_spill] sm:$0xff]  ;;  %v4831_v51 = vld [vmem:[#allocation22_spill] sm:$0xff] }
 0x1ca   :  { %v2886_v10 = vcombine.low %v4818_v5, %v1337_v56  ;;  %v1198_v49 = vrot.slane %v1197_v40, 4  ;;  %v1212_v58 = vrot.slane %v1211_v11, 4  ;;  %v4216_v26 = vor.u32 %v4102_v8, %v4100_v3  ;;  %3164 = vmatpush3.bf16.msra.mxu1 %v4170_v39  ;;  %v4830_v56 = vld [vmem:[#allocation53_spill] sm:$0xff]  ;;  %v4832_v11 = vld [vmem:[#allocation52_spill] sm:$0xff] }
 0x1cb   :  { %v4220_v22 = vor.u32 %v4109_v23, %v4107_v59  ;;  %v2150_v6 = vrot.slane %v4821_v9, 5  ;;  %v2310_v46 = vrot.slane %v2308_v54, 5  ;;  %v4822_v35 = vshll.u32 %v4062_v36, 16  ;;  %v4824_v23 = vld [vmem:[#allocation12_spill] sm:$0xff] }
 0x1cc   :  { %v2299_v27 = vsel %vm3816_vm4, %v2293_v7, %v2298_v47  ;;  %v2303_v45 = vrot.slane %v2301_v25, 5  ;;  %v4823_v21 = vshll.u32 %v4078_v0, 16  ;;  %v1203_v8 = vsel %vm3719_vm1, %v1198_v49, %v4084_v32  ;;  %3173 = vmatprep.subr.bf16.mxu1 %v4824_v23  ;;  %v4835_v49 = vld [vmem:[#allocation17_spill] sm:$0xff] }
 0x1cd   :  { %v2311_v52 = vrot.slane %v4822_v35, 6  ;;  %v1217_v59 = vsel %vm3719_vm1, %v1212_v58, %v4086_v33  ;;  %v2957_v2 = vcombine.low %v4825_v44, %v2285_v38  ;;  %v2292_v40 = vsel %vm3816_vm4, %v2286_v12, %v2291_v57  ;;  %v4829_v33 = vld [vmem:[#allocation51_spill] sm:$0xff]  ;;  %v4837_v58 = vld [vmem:[#allocation14_spill] sm:$0xff] }
 0x1ce   :  { %v2304_v3 = vrot.slane %v4823_v21, 6  ;;  %v2871_v24 = vcombine.low %v1203_v8, %v1217_v59  ;;  %v4828_v20 = vor.u32 %v4826_v37, %v4827_v17  ;;  %v2424_v54 = vrot.slane %v4821_v9, 6  ;;  %v4842_v21 = vld [vmem:[#allocation54_spill] sm:$0xff] }
 0x1cf   :  { %v2958_v42 = vcombine.low %v2292_v40, %v2299_v27  ;;  %v2300_v32 = vrot.slane %v4216_v26, 4  ;;  %v2307_v34 = vrot.slane %v4220_v22, 4  ;;  %v2884_v50 = vrot.slane %v4829_v33, 9  ;;  %3238 = vmatmul.mubr.msk.bf16.vlgmr.msra.gmra.mxu0 %vm993_vm8, %v2957_v2 }
 0x1d0   :  { %v1487_v55 = vrot.slane %v4828_v20, 4  ;;  %3158 = vmatmul.mubr.msk.bf16.gmra.mxu1 %vm993_vm8, %v2871_v24  ;;  %v1352_v15 = vrot.slane %v4830_v56, 5  ;;  %v1483_v38 = vsel %vm3816_vm4, %v4831_v51, %v4127_v19  ;;  %v2883_v5 = vrot.slane %v4832_v11, 9  ;;  %v4843_v24 = vld [vmem:[#allocation55_spill] sm:$0xff] }
 0x1d1   :  { %v2312_v47 = vor.u32 %v2311_v52, %v2310_v46  ;;  %v2305_v28 = vor.u32 %v2304_v3, %v2303_v45  ;;  %3241 = vmatprep.mubr.msk.bf16.mxu0 %vm993_vm8, %v2958_v42  ;;  %3165 = vmatprep.mubr.msk.bf16.mxu1 %vm993_vm8, %v2886_v10  ;;  %v4833_v57 = vshrl.u32 %v4832_v11, 16  ;;  %v4834_v19 = vshll.u32 %v4832_v11, 16  ;;  %v4885_v46 = vld [vmem:[#allocation46_spill] sm:$0xff] }
 0x1d2   :  { %v1493_v25 = vsel %vm3816_vm4, %v1487_v55, %v4131_v63  ;;  %v4836_v63 = vrot.slane %v4835_v49, 6  ;;  %v4838_v35 = vrot.slane %v4837_v58, 10  ;;  %v4840_v10 = vrot.slane %v4812_v13, 6 }
 0x1d3   :  { %v4260_v30 = vcombine.low %v1483_v38, %v1493_v25  ;;  %v4264_v12 = vrot.slane %v4833_v57, 5  ;;  %v4268_v7 = vrot.slane %v4834_v19, 6  ;;  %v4841_v27 = vrot.slane %v4814_v41, 10  ;;  %v4848_v57 = vld [vmem:[#allocation31_spill] sm:$0xff] }
 0x1d4   :  { %v4276_v52 = vsel %vm3713_vm0, %v4838_v35, %v4836_v63  ;;  %v1356_v3 = vrot.slane %v4842_v21, 5  ;;  %v2306_v8 = vsel %vm3816_vm4, %v2300_v32, %v2305_v28  ;;  %v2313_v59 = vsel %vm3816_vm4, %v2307_v34, %v2312_v47  ;;  %v4846_v47 = vld [vmem:[#allocation41_spill] sm:$0xff] }
 0x1d5   :  { %v4284_v45 = vsel %vm3713_vm0, %v4841_v27, %v4840_v10  ;;  %v1692_v2 = vrot.slane %v4842_v21, 6  ;;  %v1360_v40 = vrot.slane %v4843_v24, 5  ;;  %v1696_v41 = vrot.slane %v4843_v24, 6  ;;  %v4850_v35 = vld [vmem:[#allocation13_spill] sm:$0xff]  ;;  %v4883_v24 = vld [vmem:[#allocation18_spill] sm:$0xff] }
 0x1d6   :  { %v2914_v44 = vcombine.low %v4276_v52, %v4284_v45  ;;  %v1353_v37 = vsel %vm3692_vm15, %v2883_v5, %v1352_v15  ;;  %v2159_v17 = vrot.slane %v4062_v36, 5  ;;  %v2885_v20 = vrot.slane %v4105_v29, 9  ;;  %v4876_v52 = vld [vmem:[#allocation37_spill] sm:$0xff]  ;;  %v4877_v45 = vld [vmem:[#allocation38_spill] sm:$0xff] }
 0x1d7   :  { %v4844_v55 = vrot.slane %v4835_v49, 5  ;;  %v4845_v32 = vrot.slane %v4812_v13, 5  ;;  %v2433_v51 = vrot.slane %v4062_v36, 6  ;;  %v2156_v38 = vrot.slane %v4078_v0, 5  ;;  %v4852_v36 = vld [vmem:[#allocation27_spill] sm:$0xff]  ;;  %v4886_v21 = vld [vmem:[#allocation33_spill] sm:$0xff] }
 0x1d8   :  { %v2959_v25 = vcombine.low %v2306_v8, %v2313_v59  ;;  %v4847_v28 = vrot.slane %v4846_v47, 5  ;;  %v4849_v19 = vrot.slane %v4848_v57, 9  ;;  %v2430_v63 = vrot.slane %v4078_v0, 6  ;;  %v4854_v59 = vld [vmem:[#allocation34_spill] sm:$0xff] }
 0x1d9   :  { %v2137_v42 = vrot.slane %v4844_v55, 4  ;;  %v2140_v34 = vrot.slane %v4845_v32, 4  ;;  %v4851_v10 = vrot.slane %v4850_v35, 5  ;;  %v4853_v55 = vrot.slane %v4852_v36, 5  ;;  %v4855_v32 = vld [vmem:[#allocation47_spill] sm:$0xff] }
 0x1da   :  { %v1349_v5 = vsel %vm3692_vm15, %v4849_v19, %v4847_v28  ;;  %3242 = vmatmul.mubr.msk.bf16.gmra.mxu0 %vm993_vm8, %v2959_v25  ;;  %v4856_v28 = vcombine.low %v4854_v59, %v4855_v32  ;;  %v1688_v0 = vrot.slane %v4830_v56, 6  ;;  %v2155_v25 = vrot.slane %v1356_v3, 4  ;;  %v4345_v32 = vld [vmem:[%s4675_s2 + $0x48] sm:$0xff]   ;;  %v3315_v56 = vld [vmem:[%s4675_s2] sm:$0xff]  }
 0x1db   :  { %v2888_v58 = vcombine.low %v1349_v5, %v1353_v37  ;;  %v4317_v27 = vsel %vm3692_vm15, %v2137_v42, %v4851_v10  ;;  %v4323_v8 = vsel %vm3692_vm15, %v2140_v34, %v4853_v55  ;;  %v4857_v42 = vrot.slane %v4846_v47, 5  ;;  %3273 = vmatprep.mubr.msk.bf16.mxu0 %vm3411_vm5, %v4807_v1 }
 0x1dc   :  { %3166 = vmatmul.mubr.msk.bf16.vlgmr.msra.gmra.mxu1 %vm993_vm8, %v4856_v28  ;;  %v2948_v37 = vcombine.low %v4317_v27, %v4323_v8  ;;  %v2152_v5 = vrot.slane %v1352_v15, 4  ;;  %v1361_v34 = vsel %vm3692_vm15, %v2885_v20, %v1360_v40  ;;  %v2158_v10 = vrot.slane %v1360_v40, 4  ;;  %v4895_v27 = vld [vmem:[#allocation45_spill] sm:$0xff] }
 0x1dd   :  { %v2149_v19 = vrot.slane %v4857_v42, 4  ;;  %3174 = vmatpush3.bf16.msra.mxu1 %v4824_v23  ;;  %3169 = vmatprep.mubr.msk.bf16.mxu1 %vm993_vm8, %v2888_v58  ;;  %v4858_v55 = vrot.slane %v4835_v49, 6  ;;  %v4859_v15 = vrot.slane %v3962_v61, 5  ;;  %v4860_v49 = vrot.slane %v4812_v13, 6  ;;  %v4864_v61 = vld [vmem:[#allocation43_spill] sm:$0xff] }
 0x1de   :  { %3175 = vmatprep.subr.bf16.mxu1 %v4037_v4  ;;  %v4861_v58 = vrot.slane %v4846_v47, 6 }
 0x1df   :  { %v2411_v59 = vrot.slane %v4858_v55, 4  ;;  %v4351_v23 = vsel %vm3692_vm15, %v2149_v19, %v2150_v6  ;;  %v4357_v40 = vsel %vm3692_vm15, %v2152_v5, %v4859_v15  ;;  %v2414_v20 = vrot.slane %v4860_v49, 4 }
 0x1e0   :  { %v2423_v28 = vrot.slane %v4861_v58, 4  ;;  %v2950_v42 = vcombine.low %v4351_v23, %v4357_v40  ;;  %v4367_v55 = vsel %vm3692_vm15, %v2155_v25, %v2156_v38  ;;  %v4371_v6 = vsel %vm3692_vm15, %v2158_v10, %v2159_v17 }
 0x1e1   :  { %v4862_v19 = vrot.slane %v4850_v35, 6  ;;  %v1526_v5 = vor.u32 %v4268_v7, %v4264_v12  ;;  %v2951_v15 = vcombine.low %v4367_v55, %v4371_v6  ;;  %v4863_v49 = vrot.slane %v4852_v36, 6  ;;  %3176 = vmatpush3.bf16.msra.mxu1 %v4037_v4  ;;  %v959_v6 = vld [vmem:[#allocation5] sm:$0xff] }
 0x1e2   :  { %v2426_v17 = vrot.slane %v1688_v0, 4  ;;  %v1357_v35 = vsel %vm3692_vm15, %v2884_v50, %v1356_v3  ;;  %v2429_v7 = vrot.slane %v1692_v2, 4  ;;  %v2432_v36 = vrot.slane %v1696_v41, 4  ;;  %3185 = vmatprep.subr.bf16.mxu1 %v4345_v32 }
 0x1e3   :  { %v4377_v13 = vsel %vm3713_vm0, %v2411_v59, %v4862_v19  ;;  %v4387_v38 = vsel %vm3713_vm0, %v2414_v20, %v4863_v49  ;;  %v2889_v25 = vcombine.low %v1357_v35, %v1361_v34  ;;  %v1544_v10 = vrot.slane %v1205_v53, 5  ;;  %v4866_v59 = vld [vmem:[#allocation36_spill] sm:$0xff]  ;;  %v4867_v20 = vld [vmem:[#allocation35_spill] sm:$0xff] }
 0x1e4   :  { %v2964_v12 = vcombine.low %v4377_v13, %v4387_v38  ;;  %v4409_v18 = vsel %vm3713_vm0, %v2423_v28, %v2424_v54  ;;  %v4415_v4 = vsel %vm3713_vm0, %v2426_v17, %v2427_v60  ;;  %v1545_v50 = vrot.slane %v1208_v31, 6  ;;  %v4865_v54 = vld [vmem:[#allocation44_spill] sm:$0xff] }
 0x1e5   :  { %v2966_v3 = vcombine.low %v4409_v18, %v4415_v4  ;;  %v4423_v53 = vsel %vm3713_vm0, %v2429_v7, %v2430_v63  ;;  %v4427_v9 = vsel %vm3713_vm0, %v2432_v36, %v2433_v51  ;;  %3170 = vmatmul.mubr.msk.bf16.gmra.mxu1 %vm993_vm8, %v2889_v25  ;;  %v1516_v60 = vor.u32 %v4865_v54, %v4864_v61  ;;  %v4869_v19 = vld [vmem:[#allocation40_spill] sm:$0xff]  ;;  %v4870_v63 = vld [vmem:[#allocation39_spill] sm:$0xff] }
 0x1e6   :  { %v1527_v34 = vrot.slane %v1526_v5, 4  ;;  %v2967_v31 = vcombine.low %v4423_v53, %v4427_v9  ;;  %v4868_v58 = vor.u32 %v4866_v59, %v4867_v20  ;;  %v4871_v49 = vor.u32 %v4869_v19, %v4870_v63  ;;  %3177 = vmatprep.mubr.msk.bf16.mxu1 %vm993_vm8, %v4260_v30  ;;  %v4874_v59 = vld [vmem:[#allocation28_spill] sm:$0xff] }
 0x1e7   :  { %v4872_v51 = vshrl.u32 %v4829_v33, 16  ;;  %v4873_v7 = vshll.u32 %v4829_v33, 16  ;;  %v1546_v25 = vor.u32 %v1545_v50, %v1544_v10  ;;  %v1517_v61 = vrot.slane %v1516_v60, 4  ;;  %v3305_v19 = vld [vmem:[%s4675_s2 + $0x40] sm:$0xff]  }
 0x1e8   :  { %v1497_v28 = vrot.slane %v4868_v58, 4  ;;  %v1507_v17 = vrot.slane %v4871_v49, 4  ;;  %v1533_v54 = vsel %vm3816_vm4, %v1527_v34, %v4188_v43  ;;  %v2910_v63 = vrot.slane %v4848_v57, 10 }
 0x1e9   :  { %v1534_v35 = vrot.slane %v4872_v51, 5  ;;  %v1535_v5 = vrot.slane %v4873_v7, 6  ;;  %v1523_v58 = vsel %vm3816_vm4, %v1517_v61, %v4182_v48  ;;  %v1547_v50 = vrot.slane %v1546_v25, 4  ;;  %v4892_v61 = vld [vmem:[#allocation42_spill] sm:$0xff] }
 0x1ea   :  { %v1513_v36 = vsel %vm3816_vm4, %v1507_v17, %v3964_v62  ;;  %v1503_v30 = vsel %vm3816_vm4, %v1497_v28, %v4874_v59  ;;  %v2898_v62 = vcombine.low %v1523_v58, %v1533_v54  ;;  %v3314_v28 = vld [vmem:[%s4675_s2 + $0x8] sm:$0xff]   ;;  %v2913_v51 = vrot.slane %v4105_v29, 10 }
 0x1eb   :  { %v2897_v20 = vcombine.low %v1503_v30, %v1513_v36  ;;  %v1536_v10 = vor.u32 %v1535_v5, %v1534_v35  ;;  %v1553_v60 = vsel %vm3816_vm4, %v1547_v50, %v4220_v22  ;;  %v2911_v22 = vrot.slane %v4832_v11, 10  ;;  %v4880_v35 = vld [vmem:[#allocation16_spill] sm:$0xff]  ;;  %v4889_v36 = vld [vmem:[#allocation49_spill] sm:$0xff] }
 0x1ec   :  { %v2912_v11 = vrot.slane %v4829_v33, 10  ;;  %v1697_v29 = vsel %vm3713_vm0, %v2913_v51, %v1696_v41  ;;  %v4882_v33 = vld [vmem:[#allocation29_spill] sm:$0xff]  ;;  %v4888_v41 = vld [vmem:[#allocation50_spill] sm:$0xff] }
 0x1ed   :  { %3178 = vmatmul.mubr.msk.bf16.vlgmr.msra.gmra.mxu1 %vm993_vm8, %v2897_v20  ;;  %v1537_v43 = vrot.slane %v1536_v10, 4  ;;  %v1689_v16 = vsel %vm3713_vm0, %v2911_v22, %v1688_v0  ;;  %v4879_v0 = vld [vmem:[#allocation19_spill] sm:$0xff]  ;;  %v4884_v5 = vpack.c.bf16 %v4882_v33, %v4883_v24  ;;  %v4890_v25 = vpack.c.bf16 %v4888_v41, %v4889_v36  ;;  %v3312_v36 = vld [vmem:[#allocation7 + $0x8] sm:$0xff]  }
 0x1ee   :  { %3186 = vmatpush3.bf16.msra.mxu1 %v4345_v32  ;;  %3181 = vmatprep.mubr.msk.bf16.mxu1 %vm993_vm8, %v2898_v62  ;;  %v4881_v7 = vpack.c.bf16 %v4879_v0, %v4880_v35  ;;  %v3310_v0 = vld [vmem:[#allocation7 + $0x18] sm:$0xff]  }
 0x1ef   :  { %3187 = vmatprep.subr.bf16.mxu1 %v3305_v19  ;;  %v1543_v48 = vsel %vm3816_vm4, %v1537_v43, %v4216_v26  ;;  %v4875_v26 = vrot.slane %v4846_v47, 6  ;;  %v1693_v47 = vsel %vm3713_vm0, %v2912_v11, %v1692_v2  ;;  %v4887_v2 = vpack.c.bf16 %v4885_v46, %v4886_v21  ;;  %v3306_v43 = vld [vmem:[#allocation7 + $0x38] sm:$0xff]  }
 0x1f0   :  { %v2899_v34 = vcombine.low %v1543_v48, %v1553_v60  ;;  %v2917_v57 = vcombine.low %v1693_v47, %v1697_v29  ;;  %3258 = vmatpush3.bf16.msra.mxu0 %v3306_v43 }
 0x1f1   :  { %v1685_v49 = vsel %vm3713_vm0, %v2910_v63, %v4875_v26  ;;  %3259 = vmatprep.subr.bf16.mxu0 %v4807_v1 }
 0x1f2   :  { %3188 = vmatpush3.bf16.msra.mxu1 %v3305_v19  ;;  %v2916_v17 = vcombine.low %v1685_v49, %v1689_v16 }
 0x1f3   :  { %3197 = vmatprep.subr.bf16.mxu1 %v3314_v28 }
 0x1f5   :  { %3182 = vmatmul.mubr.msk.bf16.gmra.mxu1 %vm993_vm8, %v2899_v34 }
 0x1f6   :  { %3189 = vmatprep.mubr.msk.bf16.mxu1 %vm993_vm8, %v2914_v44  ;;  %v4878_v44 = vcombine.low %v4876_v52, %v4877_v45 }
 0x1fd   :  { %3190 = vmatmul.mubr.msk.bf16.vlgmr.msra.gmra.mxu1 %vm993_vm8, %v4878_v44 }
 0x1fe   :  { %3198 = vmatpush3.bf16.msra.mxu1 %v3314_v28  ;;  %3193 = vmatprep.mubr.msk.bf16.mxu1 %vm993_vm8, %v2916_v17  ;;  %v3307_v28 = vld [vmem:[#allocation7 + $0x30] sm:$0xff]   ;;  %v3308_v17 = vld [vmem:[#allocation7 + $0x28] sm:$0xff]  }
 0x1ff   :  { %3199 = vmatprep.subr.bf16.mxu1 %v3315_v56  ;;  %3260 = vmatpush3.bf16.msra.mxu0 %v3307_v28 }
 0x200   :  { %3261 = vmatprep.subr.bf16.mxu0 %v4807_v1 }
 0x202   :  { %3200 = vmatpush3.bf16.msra.mxu1 %v3315_v56  ;;  %v3309_v56 = vld [vmem:[#allocation7 + $0x20] sm:$0xff]  }
 0x203   :  { %3221 = vmatprep.subr.bf16.mxu1 %v3780_v14  ;;  %3262 = vmatpush3.bf16.msra.mxu0 %v3308_v17 }
 0x204   :  { %3263 = vmatprep.subr.bf16.mxu0 %v4807_v1 }
 0x205   :  { %3194 = vmatmul.mubr.msk.bf16.gmra.mxu1 %vm993_vm8, %v2917_v57 }
 0x206   :  { %3201 = vmatprep.mubr.msk.bf16.mxu1 %vm993_vm8, %v4881_v7 }
 0x207   :  { %3264 = vmatpush3.bf16.msra.mxu0 %v3309_v56 }
 0x208   :  { %3265 = vmatprep.subr.bf16.mxu0 %v4807_v1 }
 0x20b   :  { %3266 = vmatpush3.bf16.msra.mxu0 %v3310_v0 }
 0x20c   :  { %3267 = vmatprep.subr.bf16.mxu0 %v4807_v1 }
 0x20d   :  { %3202 = vmatmul.mubr.msk.bf16.vlgmr.msra.gmra.mxu1 %vm993_vm8, %v4884_v5  ;;  %v3311_v5 = vld [vmem:[#allocation7 + $0x10] sm:$0xff]  }
 0x20e   :  { %3222 = vmatpush3.bf16.msra.mxu1 %v3780_v14  ;;  %3205 = vmatprep.mubr.msk.bf16.mxu1 %vm993_vm8, %v4887_v2  ;;  %v4891_v14 = vld [vmem:[#allocation30_spill] sm:$0xff] }
 0x20f   :  { %3223 = vmatprep.subr.bf16.mxu1 %v4170_v39  ;;  %v4893_v54 = vcombine.low %v4891_v14, %v4892_v61  ;;  %3268 = vmatpush3.bf16.msra.mxu0 %v3311_v5 }
 0x210   :  { %3269 = vmatprep.subr.bf16.mxu0 %v4807_v1 }
 0x212   :  { %3224 = vmatpush3.bf16.msra.mxu1 %v4170_v39  ;;  %v4894_v39 = vld [vmem:[#allocation25_spill] sm:$0xff] }
 0x213   :  { %3245 = vmatprep.subr.bf16.mxu1 %v4345_v32  ;;  %v4896_v8 = vcombine.low %v4894_v39, %v4895_v27  ;;  %3270 = vmatpush3.bf16.msra.mxu0 %v3312_v36  ;;  %v3313_v39 = vld [vmem:[#allocation7] sm:$0xff]  }
 0x214   :  { %3271 = vmatprep.subr.bf16.mxu0 %v4807_v1 }
 0x215   :  { %3206 = vmatmul.mubr.msk.bf16.gmra.mxu1 %vm993_vm8, %v4890_v25 }
 0x216   :  { %3225 = vmatprep.mubr.msk.bf16.mxu1 %vm993_vm8, %v2948_v37 }
 0x217   :  { %3272 = vmatpush3.bf16.msra.mxu0 %v3313_v39 }
 0x21d   :  { %3226 = vmatmul.mubr.msk.bf16.vlgmr.msra.gmra.mxu1 %vm993_vm8, %v4893_v54 }
 0x21e   :  { %3246 = vmatpush3.bf16.msra.mxu1 %v4345_v32  ;;  %3229 = vmatprep.mubr.msk.bf16.mxu1 %vm993_vm8, %v2950_v42 }
 0x21f   :  { %3247 = vmatprep.subr.bf16.mxu1 %v3305_v19 }
 0x222   :  { %3248 = vmatpush3.bf16.msra.mxu1 %v3305_v19 }
 0x225   :  { %3230 = vmatmul.mubr.msk.bf16.gmra.mxu1 %vm993_vm8, %v2951_v15 }
 0x226   :  { %3249 = vmatprep.mubr.msk.bf16.mxu1 %vm993_vm8, %v2964_v12 }
 0x22d   :  { %3250 = vmatmul.mubr.msk.bf16.vlgmr.msra.gmra.mxu1 %vm993_vm8, %v4896_v8 }
 0x22e   :  { %3253 = vmatprep.mubr.msk.bf16.mxu1 %vm993_vm8, %v2966_v3 }
 0x235   :  { %3254 = vmatmul.mubr.msk.bf16.gmra.mxu1 %vm993_vm8, %v2967_v31  ;;  %vm2665_vm8 = vcmask 1043459  }
 0x254   :  { %v3143_v37 = vpop.f32.mrf.mxu1 }
 0x255   :  { %v1073_v38 = vadd.f32 %v3143_v37, %v959_v6 }
 0x256   :  { %v1040_v32 = vpop.f32.mrf.mxu1 }
 0x257   :  { %v1071_v59 = vadd.f32 %v1040_v32, %v959_v6 }
 0x258   :  { %v3144_v23 = vpop.f32.mrf.mxu1 }
 0x259   :  { %v1074_v3 = vadd.f32 %v3144_v23, %v959_v6 }
 0x25a   :  { %v1043_v40 = vpop.f32.mrf.mxu1 }
 0x25b   :  { %v1072_v53 = vadd.f32 %v1043_v40, %v959_v6 }
 0x27c   :  { %v3147_v42 = vpop.f32.mrf.mxu1 }
 0x27d   :  { %v1077_v19 = vadd.f32 %v3147_v42, %v959_v6 }
 0x27e   :  { %v1056_v55 = vpop.f32.mrf.mxu1 }
 0x27f   :  { %v1075_v10 = vadd.f32 %v1056_v55, %v959_v6 }
 0x280   :  { %v3148_v13 = vpop.f32.mrf.mxu1 }
 0x281   :  { %v1078_v48 = vadd.f32 %v3148_v13, %v959_v6 }
 0x282   :  { %v1059_v15 = vpop.f32.mrf.mxu1 }
 0x283   :  { %v1076_v63 = vadd.f32 %v1059_v15, %v959_v6 }
 0x285   :  { %v3155_v12 = vpop.f32.mrf.mxu1 }
 0x286   :  { %v1321_v18 = vadd.f32 %v3155_v12, %v1073_v38  ;;  %v4571_v12 = vpop.f32.mrf.mxu0 }
 0x287   :  { %v1288_v4 = vpop.f32.mrf.mxu1 }
 0x288   :  { %v1319_v30 = vadd.f32 %v1288_v4, %v1071_v59  ;;  %v4573_v4 = vpop.f32.mrf.mxu0 }
 0x289   :  { %v3156_v20 = vpop.f32.mrf.mxu1 }
 0x28a   :  { %v1322_v9 = vadd.f32 %v3156_v20, %v1074_v3 }
 0x28b   :  { %v1291_v31 = vpop.f32.mrf.mxu1 }
 0x28c   :  { %v1320_v58 = vadd.f32 %v1291_v31, %v1072_v53 }
 0x290   :  { %v3159_v62 = vpop.f32.mrf.mxu1 }
 0x291   :  { %v1325_v50 = vadd.f32 %v3159_v62, %v1077_v19 }
 0x292   :  { %v1304_v60 = vpop.f32.mrf.mxu1 }
 0x293   :  { %v1323_v34 = vadd.f32 %v1304_v60, %v1075_v10 }
 0x294   :  { %v3160_v22 = vpop.f32.mrf.mxu1 }
 0x295   :  { %v1326_v16 = vadd.f32 %v3160_v22, %v1078_v48 }
 0x296   :  { %v1307_v26 = vpop.f32.mrf.mxu1 }
 0x297   :  { %v1324_v49 = vadd.f32 %v1307_v26, %v1076_v63 }
 0x29c   :  { %v3167_v51 = vpop.f32.mrf.mxu1 }
 0x29d   :  { %v1465_v52 = vadd.f32 %v3167_v51, %v1321_v18 }
 0x29e   :  { %v1432_v45 = vpop.f32.mrf.mxu1 }
 0x29f   :  { %v1463_v44 = vadd.f32 %v1432_v45, %v1319_v30  ;;  %v4575_v30 = vpop.f32.mrf.mxu0 }
 0x2a0   :  { %v3168_v11 = vpop.f32.mrf.mxu1 }
 0x2a1   :  { %v1466_v29 = vadd.f32 %v3168_v11, %v1322_v9  ;;  %v4577_v9 = vpop.f32.mrf.mxu0 }
 0x2a2   :  { %v1435_v47 = vpop.f32.mrf.mxu1 }
 0x2a3   :  { %v1464_v57 = vadd.f32 %v1435_v47, %v1320_v58  ;;  %v4579_v58 = vpop.f32.mrf.mxu0 }
 0x2a5   :  { %v3171_v35 = vpop.f32.mrf.mxu1  ;;  %v4581_v60 = vpop.f32.mrf.mxu0 }
 0x2a6   :  { %v1469_v7 = vadd.f32 %v3171_v35, %v1325_v50 }
 0x2a7   :  { %v1448_v33 = vpop.f32.mrf.mxu1 }
 0x2a8   :  { %v1467_v24 = vadd.f32 %v1448_v33, %v1323_v34 }
 0x2a9   :  { %v3172_v46 = vpop.f32.mrf.mxu1 }
 0x2aa   :  { %v1470_v21 = vadd.f32 %v3172_v46, %v1326_v16 }
 0x2ab   :  { %v1451_v2 = vpop.f32.mrf.mxu1 }
 0x2ac   :  { %v4567_v41 = vadd.f32 %v1451_v2, %v1324_v49  ;;  %v4585_v49 = vpop.f32.mrf.mxu0 }
 0x2ad   :  { %v3179_v25 = vpop.f32.mrf.mxu1 }
 0x2ae   :  { %v1657_v14 = vadd.f32 %v3179_v25, %v1465_v52  ;;  %v4591_v47 = vpop.f32.mrf.mxu0 }
 0x2af   :  { %v1624_v61 = vpop.f32.mrf.mxu1 }
 0x2b0   :  { %v1655_v54 = vadd.f32 %v1624_v61, %v1463_v44  ;;  %v3239_v2 = vpop.f32.mrf.mxu0  ;;  %v4595_v61 = vld [vmem:[#allocation5 + $0x8] sm:$0xff] }
 0x2b1   :  { %v3180_v27 = vpop.f32.mrf.mxu1 }
 0x2b2   :  { %v1658_v8 = vadd.f32 %v3180_v27, %v1466_v29 }
 0x2b3   :  { %v1627_v37 = vpop.f32.mrf.mxu1 }
 0x2b4   :  { %v1656_v32 = vadd.f32 %v1627_v37, %v1464_v57 }
 0x2b5   :  { %v3183_v23 = vpop.f32.mrf.mxu1 }
 0x2b6   :  { %v1661_v40 = vadd.f32 %v3183_v23, %v1469_v7 }
 0x2b7   :  { %v1640_v42 = vpop.f32.mrf.mxu1 }
 0x2b8   :  { %v1659_v45 = vadd.f32 %v1640_v42, %v1467_v24 }
 0x2b9   :  { %v3184_v55 = vpop.f32.mrf.mxu1 }
 0x2ba   :  { %v1662_v6 = vadd.f32 %v3184_v55, %v1470_v21 }
 0x2bb   :  { %v1643_v13 = vpop.f32.mrf.mxu1 }
 0x2bc   :  { %v1660_v23 = vadd.f32 %v1643_v13, %v4567_v41 }
 0x2bd   :  { %v3191_v15 = vpop.f32.mrf.mxu1 }
 0x2be   :  { %v1801_v19 = vadd.f32 %v3191_v15, %v1657_v14 }
 0x2bf   :  { %v1768_v38 = vpop.f32.mrf.mxu1 }
 0x2c0   :  { %v1799_v10 = vadd.f32 %v1768_v38, %v1655_v54  ;;  %v1819_v34 = vrot.slane %v1801_v19, 4 }
 0x2c1   :  { %v3192_v59 = vpop.f32.mrf.mxu1 }
 0x2c2   :  { %v1802_v50 = vadd.f32 %v3192_v59, %v1658_v8  ;;  %v1807_v22 = vrot.slane %v1799_v10, 4  ;;  %v1820_v51 = vmax.f32 %v1801_v19, %v1819_v34 }
 0x2c3   :  { %v1771_v18 = vpop.f32.mrf.mxu1 }
 0x2c4   :  { %v1800_v48 = vadd.f32 %v1771_v18, %v1656_v32  ;;  %v1825_v63 = vrot.slane %v1802_v50, 4  ;;  %v1808_v44 = vmax.f32 %v1799_v10, %v1807_v22  ;;  %v1821_v0 = vrot.slane %v1820_v51, 2  ;;  %v2372_v32 = vpop.f32.mrf.mxu0 }
 0x2c5   :  { %v3195_v3 = vpop.f32.mrf.mxu1 }
 0x2c6   :  { %v1805_v16 = vadd.f32 %v3195_v3, %v1661_v40  ;;  %v1813_v17 = vrot.slane %v1800_v48, 4  ;;  %v1826_v56 = vmax.f32 %v1802_v50, %v1825_v63  ;;  %v1809_v33 = vrot.slane %v1808_v44, 2  ;;  %v3240_v10 = vpop.f32.mrf.mxu0 }
 0x2c7   :  { %v1784_v1 = vpop.f32.mrf.mxu1  ;;  %v1822_v25 = vmax.f32 %v1820_v51, %v1821_v0 }
 0x2c8   :  { %v1843_v11 = vrot.slane %v1805_v16, 4  ;;  %v1814_v57 = vmax.f32 %v1800_v48, %v1813_v17  ;;  %v1803_v35 = vadd.f32 %v1784_v1, %v1659_v45  ;;  %v1827_v5 = vrot.slane %v1826_v56, 2 }
 0x2c9   :  { %v3196_v20 = vpop.f32.mrf.mxu1  ;;  %v1810_v39 = vmax.f32 %v1808_v44, %v1809_v33  ;;  %v1823_v55 = vrot.slane %v1822_v25, 1 }
 0x2ca   :  { %v1844_v46 = vmax.f32 %v1805_v16, %v1843_v11  ;;  %v1815_v36 = vrot.slane %v1814_v57, 2  ;;  %v1831_v24 = vrot.slane %v1803_v35, 4  ;;  %v1806_v14 = vadd.f32 %v3196_v20, %v1662_v6 }
 0x2cb   :  { %v1787_v53 = vpop.f32.mrf.mxu1  ;;  %v1828_v27 = vmax.f32 %v1826_v56, %v1827_v5  ;;  %v1811_v3 = vrot.slane %v1810_v39, 1  ;;  %v4602_v13 = vmax.f32 %v1822_v25, %v1823_v55 }
 0x2cc   :  { %v1845_v8 = vrot.slane %v1844_v46, 2  ;;  %v1816_v40 = vmax.f32 %v1814_v57, %v1815_v36  ;;  %v1832_v15 = vmax.f32 %v1803_v35, %v1831_v24  ;;  %v1849_v38 = vrot.slane %v1806_v14, 4 }
 0x2cd   :  { %v3203_v31 = vpop.f32.mrf.mxu1  ;;  %v1804_v18 = vadd.f32 %v1787_v53, %v1660_v23  ;;  %v1829_v1 = vrot.slane %v1828_v27, 1  ;;  %v4606_v17 = vmax.f32 %v1810_v39, %v1811_v3  ;;  %v1857_v57 = vmax.f32 %v4602_v13, -1e+30 }
 0x2ce   :  { %v1946_v42 = vadd.f32 %v3203_v31, %v4595_v61  ;;  %v1846_v20 = vmax.f32 %v1844_v46, %v1845_v8  ;;  %v1817_v50 = vrot.slane %v1816_v40, 1  ;;  %v1833_v31 = vrot.slane %v1832_v15, 2 }
 0x2cf   :  { %v1913_v62 = vpop.f32.mrf.mxu1  ;;  %v1850_v34 = vmax.f32 %v1806_v14, %v1849_v38  ;;  %v1837_v63 = vrot.slane %v1804_v18, 4  ;;  %v4608_v51 = vmax.f32 %v1828_v27, %v1829_v1  ;;  %v1855_v36 = vmax.f32 %v4606_v17, -1e+30 }
 0x2d0   :  { %v1944_v6 = vadd.f32 %v1913_v62, %v4595_v61  ;;  %v2131_v41 = vadd.f32 %v4571_v12, %v1946_v42  ;;  %v1847_v45 = vrot.slane %v1846_v20, 1  ;;  %v4610_v56 = vmax.f32 %v1816_v40, %v1817_v50 }
 0x2d1   :  { %v3204_v43 = vpop.f32.mrf.mxu1  ;;  %v1834_v0 = vmax.f32 %v1832_v15, %v1833_v31  ;;  %v1851_v35 = vrot.slane %v1850_v34, 2  ;;  %v1838_v33 = vmax.f32 %v1804_v18, %v1837_v63  ;;  %v1858_v25 = vmax.f32 %v4608_v51, -1e+30 }
 0x2d2   :  { %v1947_v48 = vadd.f32 %v3204_v43, %v4595_v61  ;;  %v2129_v62 = vadd.f32 %v4573_v4, %v1944_v6  ;;  %v2375_v43 = vpop.f32.mrf.mxu0  ;;  %v4619_v24 = vmax.f32 %v1846_v20, %v1847_v45  ;;  %v1856_v39 = vmax.f32 %v4610_v56, -1e+30 }
 0x2d3   :  { %v1916_v28 = vpop.f32.mrf.mxu1  ;;  %v4624_v23 = vmax.f32 %v1850_v34, %v1851_v35  ;;  %v1839_v42 = vrot.slane %v1838_v33, 2 }
 0x2d4   :  { %v1945_v53 = vadd.f32 %v1916_v28, %v4595_v61  ;;  %v2132_v11 = vadd.f32 %v4575_v30, %v1947_v48  ;;  %v1861_v38 = vmax.f32 %v4619_v24, -1e+30 }
 0x2d5   :  { %v4583_v26 = vpop.f32.mrf.mxu1  ;;  %v1853_v48 = vrot.slane %v4624_v23, 1 }
 0x2d6   :  { %v1950_v28 = vadd.f32 %v4583_v26, %v4595_v61  ;;  %v2130_v46 = vadd.f32 %v4577_v9, %v1945_v53 }
 0x2d7   :  { %v4587_v52 = vpop.f32.mrf.mxu1  ;;  %v1854_v17 = vmax.f32 %v4624_v23, %v1853_v48 }
 0x2d8   :  { %v1948_v30 = vadd.f32 %v4587_v52, %v4595_v61 }
 0x2d9   :  { %v4589_v29 = vpop.f32.mrf.mxu1 }
 0x2da   :  { %v1951_v9 = vadd.f32 %v4589_v29, %v4595_v61 }
 0x2db   :  { %v4593_v7 = vpop.f32.mrf.mxu1 }
 0x2dd   :  { %v3227_v21 = vpop.f32.mrf.mxu1 }
 0x2de   :  { %v2252_v16 = vadd.f32 %v3227_v21, %v2131_v41 }
 0x2df   :  { %v2219_v54 = vpop.f32.mrf.mxu1 }
 0x2e0   :  { %v2250_v12 = vadd.f32 %v2219_v54, %v2129_v62  ;;  %v2405_v21 = vadd.f32 %v3239_v2, %v2252_v16  ;;  %v3243_v54 = vpop.f32.mrf.mxu0  ;;  %v2135_v2 = vadd.f32 %v4579_v58, %v1950_v28 }
 0x2e1   :  { %v3228_v37 = vpop.f32.mrf.mxu1 }
 0x2e2   :  { %v2253_v5 = vadd.f32 %v3228_v37, %v2132_v11  ;;  %v2403_v8 = vadd.f32 %v2372_v32, %v2250_v12  ;;  %v1835_v37 = vrot.slane %v1834_v0, 1  ;;  %v2133_v32 = vadd.f32 %v4581_v60, %v1948_v30  ;;  %v2388_v3 = vpop.f32.mrf.mxu0 }
 0x2e3   :  { %v2222_v59 = vpop.f32.mrf.mxu1 }
 0x2e4   :  { %v2251_v26 = vadd.f32 %v2222_v59, %v2130_v46  ;;  %v2406_v52 = vadd.f32 %v3240_v10, %v2253_v5  ;;  %v1949_v59 = vadd.f32 %v4593_v7, %v4595_v61  ;;  %v4633_v58 = vmax.f32 %v1834_v0, %v1835_v37  ;;  %v3244_v45 = vpop.f32.mrf.mxu0 }
 0x2e5   :  { %v3231_v19 = vpop.f32.mrf.mxu1  ;;  %v2136_v10 = vadd.f32 %v4585_v49, %v1951_v9 }
 0x2e6   :  { %v2256_v18 = vadd.f32 %v3231_v19, %v2135_v2  ;;  %v2404_v50 = vadd.f32 %v2375_v43, %v2251_v26  ;;  %v1840_v19 = vmax.f32 %v1838_v33, %v1839_v42  ;;  %v2134_v53 = vadd.f32 %v4591_v47, %v1949_v59 }
 0x2e7   :  { %v2235_v22 = vpop.f32.mrf.mxu1 }
 0x2e8   :  { %v2254_v41 = vadd.f32 %v2235_v22, %v2133_v32  ;;  %v2409_v16 = vadd.f32 %v3243_v54, %v2256_v18  ;;  %v1859_v22 = vmax.f32 %v4633_v58, -1e+30 }
 0x2e9   :  { %v3232_v44 = vpop.f32.mrf.mxu1 }
 0x2ea   :  { %v2257_v60 = vadd.f32 %v3232_v44, %v2136_v10  ;;  %v2407_v28 = vadd.f32 %v2388_v3, %v2254_v41  ;;  %v1841_v44 = vrot.slane %v1840_v19, 1 }
 0x2eb   :  { %v2238_v4 = vpop.f32.mrf.mxu1 }
 0x2ec   :  { %v2255_v35 = vadd.f32 %v2238_v4, %v2134_v53  ;;  %v2410_v54 = vadd.f32 %v3244_v45, %v2257_v60  ;;  %v4642_v4 = vld [vmem:[%s4677_s4] ss:$0 sm:$0xff] }
 0x2ed   :  { %v3251_v14 = vpop.f32.mrf.mxu1 }
 0x2ee   :  { %v2526_v27 = vadd.f32 %v3251_v14, %v2405_v21 }
 0x2ef   :  { %v2493_v40 = vpop.f32.mrf.mxu1 }
 0x2f0   :  { %v2544_v55 = vrot.slane %v2526_v27, 4  ;;  %v2524_v15 = vadd.f32 %v2493_v40, %v2403_v8 }
 0x2f1   :  { %v3252_v6 = vpop.f32.mrf.mxu1 }
 0x2f2   :  { %v2545_v1 = vmax.f32 %v2526_v27, %v2544_v55  ;;  %v2532_v20 = vrot.slane %v2524_v15, 4  ;;  %v2527_v29 = vadd.f32 %v3252_v6, %v2406_v52  ;;  %v2391_v27 = vpop.f32.mrf.mxu0 }
 0x2f3   :  { %v2496_v31 = vpop.f32.mrf.mxu1 }
 0x2f4   :  { %v2546_v34 = vrot.slane %v2545_v1, 2  ;;  %v2533_v63 = vmax.f32 %v2524_v15, %v2532_v20  ;;  %v2550_v7 = vrot.slane %v2527_v29, 4  ;;  %v2525_v61 = vadd.f32 %v2496_v31, %v2404_v50 }
 0x2f5   :  { %v3255_v62 = vpop.f32.mrf.mxu1  ;;  %v2408_v15 = vadd.f32 %v2391_v27, %v2255_v35 }
 0x2f6   :  { %v2547_v43 = vmax.f32 %v2545_v1, %v2546_v34  ;;  %v2534_v12 = vrot.slane %v2533_v63, 2  ;;  %v2551_v11 = vmax.f32 %v2527_v29, %v2550_v7  ;;  %v2538_v0 = vrot.slane %v2525_v61, 4 }
 0x2f7   :  { %v2530_v49 = vadd.f32 %v3255_v62, %v2409_v16  ;;  %v2509_v5 = vpop.f32.mrf.mxu1 }
 0x2f8   :  { %v2548_v46 = vrot.slane %v2547_v43, 1  ;;  %v2535_v21 = vmax.f32 %v2533_v63, %v2534_v12  ;;  %v2552_v30 = vrot.slane %v2551_v11, 2  ;;  %v2539_v33 = vmax.f32 %v2525_v61, %v2538_v0 }
 0x2f9   :  { %v2568_v14 = vrot.slane %v2530_v49, 4  ;;  %v2528_v47 = vadd.f32 %v2509_v5, %v2407_v28  ;;  %v3256_v26 = vpop.f32.mrf.mxu1 }
 0x2fa   :  { %v2549_v8 = vmax.f32 %v2547_v43, %v2548_v46  ;;  %v2536_v37 = vrot.slane %v2535_v21, 1  ;;  %v2553_v9 = vmax.f32 %v2551_v11, %v2552_v30  ;;  %v2540_v2 = vrot.slane %v2539_v33, 2 }
 0x2fb   :  { %v2569_v40 = vmax.f32 %v2530_v49, %v2568_v14  ;;  %v2556_v42 = vrot.slane %v2528_v47, 4  ;;  %v2531_v55 = vadd.f32 %v3256_v26, %v2410_v54  ;;  %v2512_v52 = vpop.f32.mrf.mxu1 }
 0x2fc   :  { %v2582_v59 = vmax.f32 %v1857_v57, %v2549_v8  ;;  %v2537_v18 = vmax.f32 %v2535_v21, %v2536_v37  ;;  %v2554_v32 = vrot.slane %v2553_v9, 1  ;;  %v2541_v6 = vmax.f32 %v2539_v33, %v2540_v2 }
 0x2fd   :  { %v2570_v3 = vrot.slane %v2569_v40, 2  ;;  %v2557_v1 = vmax.f32 %v2528_v47, %v2556_v42  ;;  %v2574_v20 = vrot.slane %v2531_v55, 4  ;;  %v2529_v29 = vadd.f32 %v2512_v52, %v2408_v15 }
 0x2fe   :  { %v2597_v50 = vadd.f32 %v4642_v4, %v2582_v59  ;;  %v2580_v41 = vmax.f32 %v1855_v36, %v2537_v18  ;;  %v2555_v10 = vmax.f32 %v2553_v9, %v2554_v32  ;;  %v2542_v31 = vrot.slane %v2541_v6, 1 }
 0x2ff   :  { %v2571_v34 = vmax.f32 %v2569_v40, %v2570_v3  ;;  %v2558_v63 = vrot.slane %v2557_v1, 2  ;;  %v2575_v7 = vmax.f32 %v2531_v55, %v2574_v20  ;;  %v2562_v61 = vrot.slane %v2529_v29, 4 }
 0x300   :  { %v2605_v13 = vmax.f32 %v2597_v50, 0.0  ;;  %v2595_v57 = vadd.f32 %v4642_v4, %v2580_v41  ;;  %v2583_v60 = vmax.f32 %v1858_v25, %v2555_v10  ;;  %v2543_v53 = vmax.f32 %v2541_v6, %v2542_v31 }
 0x301   :  { %v2572_v16 = vrot.slane %v2571_v34, 1  ;;  %v2559_v62 = vmax.f32 %v2557_v1, %v2558_v63  ;;  %v2576_v45 = vrot.slane %v2575_v7, 2  ;;  %v2563_v43 = vmax.f32 %v2529_v29, %v2562_v61 }
 0x302   :  { %v1842_v36 = vmax.f32 %v1840_v19, %v1841_v44  ;;  %v2598_v12 = vadd.f32 %v4642_v4, %v2583_v60  ;;  %v2581_v11 = vmax.f32 %v1856_v39, %v2543_v53  ;;  %v2613_v25 = vpack.c.bf16 %v2605_v13, %v2605_v13 }
 0x303   :  { %v2573_v0 = vmax.f32 %v2571_v34, %v2572_v16  ;;  %v2560_v35 = vrot.slane %v2559_v62, 1  ;;  %v2577_v49 = vmax.f32 %v2575_v7, %v2576_v45  ;;  %v2564_v51 = vrot.slane %v2563_v43, 2 }
 0x304   :  { %v2603_v28 = vmax.f32 %v2595_v57, 0.0  ;;  %v2606_v5 = vmax.f32 %v2598_v12, 0.0  ;;  %v2596_v46 = vadd.f32 %v4642_v4, %v2581_v11  ;;  %v1862_v19 = vmax.f32 %v1854_v17, -1e+30 }
 0x305   :  { %v2586_v21 = vmax.f32 %v1861_v38, %v2573_v0  ;;  %v2561_v30 = vmax.f32 %v2559_v62, %v2560_v35  ;;  %v2578_v23 = vrot.slane %v2577_v49, 1  ;;  %v2565_v48 = vmax.f32 %v2563_v43, %v2564_v51  ;;  %v2973_v43 = vld [vmem:[%s4679_s6] ss:$0 sm:$0xff] }
 0x306   :  { %v2614_v33 = vpack.c.bf16 %v2606_v5, %v2606_v5  ;;  %v2604_v44 = vmax.f32 %v2596_v46, 0.0  ;;  %v1860_v54 = vmax.f32 %v1842_v36, -1e+30  ;;  %v2611_v26 = vpack.c.bf16 %v2603_v28, %v2603_v28 }
 0x307   :  { %v2601_v56 = vadd.f32 %v4642_v4, %v2586_v21  ;;  %v2584_v39 = vmax.f32 %v1859_v22, %v2561_v30  ;;  %v2579_v14 = vmax.f32 %v2577_v49, %v2578_v23  ;;  %v2566_v47 = vrot.slane %v2565_v48, 1 }
 0x308   :  { %v2612_v27 = vpack.c.bf16 %v2604_v44, %v2604_v44  ;;  %v2652_v8 = vunpack.c.l.b16 %v2613_v25  ;;  %v2653_v9 = vunpack.c.l.b16 %v2614_v33  ;;  %v2650_v58 = vunpack.c.l.b16 %v2611_v26 }
 0x309   :  { %v2599_v24 = vadd.f32 %v4642_v4, %v2584_v39  ;;  %v2587_v38 = vmax.f32 %v1862_v19, %v2579_v14  ;;  %v2567_v37 = vmax.f32 %v2565_v48, %v2566_v47  ;;  %v2609_v40 = vmax.f32 %v2601_v56, 0.0 }
 0x30a   :  { %v2651_v2 = vunpack.c.l.b16 %v2612_v27  ;;  %v2661_v52 = vrot.slane %v2652_v8, 6  ;;  %v2664_v6 = vrot.slane %v2653_v9, 5 }
 0x30b   :  { %v2607_v42 = vmax.f32 %v2599_v24, 0.0  ;;  %v2602_v55 = vadd.f32 %v4642_v4, %v2587_v38  ;;  %v2585_v15 = vmax.f32 %v1860_v54, %v2567_v37  ;;  %v2617_v20 = vpack.c.bf16 %v2609_v40, %v2609_v40 }
 0x30c   :  { %v2658_v22 = vrot.slane %v2651_v2, 7 }
 0x30d   :  { %v2615_v59 = vpack.c.bf16 %v2607_v42, %v2607_v42  ;;  %v2610_v18 = vmax.f32 %v2602_v55, 0.0  ;;  %v2600_v32 = vadd.f32 %v4642_v4, %v2585_v15  ;;  %v2656_v63 = vunpack.c.l.b16 %v2617_v20 }
 0x30e   :  { %v2660_v3 = vsel %vm2659_vm6, %v2658_v22, %v2650_v58 }
 0x30f   :  { %v2663_v1 = vsel %vm2662_vm7, %v2661_v52, %v2660_v3  ;;  %v2654_v29 = vunpack.c.l.b16 %v2615_v59  ;;  %v2618_v41 = vpack.c.bf16 %v2610_v18, %v2610_v18  ;;  %v2608_v10 = vmax.f32 %v2600_v32, 0.0 }
 0x310   :  { %v2666_v50 = vsel %vm2665_vm8, %v2664_v6, %v2663_v1  ;;  %v2673_v60 = vrot.slane %v2656_v63, 2 }
 0x311   :  { %v2667_v31 = vrot.slane %v2654_v29, 4  ;;  %v2616_v34 = vpack.c.bf16 %v2608_v10, %v2608_v10  ;;  %v2657_v61 = vunpack.c.l.b16 %v2618_v41 }
 0x313   :  { %v2669_v7 = vsel %vm2668_vm9, %v2667_v31, %v2666_v50  ;;  %v2655_v13 = vunpack.c.l.b16 %v2616_v34  ;;  %v2676_v4 = vrot.slane %v2657_v61, 1 }
 0x315   :  { %v2670_v57 = vrot.slane %v2655_v13, 3 }
 0x317   :  { %v2672_v53 = vsel %vm2671_vm10, %v2670_v57, %v2669_v7 }
 0x318   :  { %v2675_v16 = vsel %vm2674_vm11, %v2673_v60, %v2672_v53 }
 0x319   :  { %v2678_v62 = vsel %vm2677_vm12, %v2676_v4, %v2675_v16 }
 0x31a   :  { %v2679_v45 = vpack.c.b16 %v2678_v62, %v2678_v62 }
 0x31c   :  { %3274 = vmatmul.mubr.bf16.vlgmr.msra.gmra.mxu0 %v2679_v45 }
 0x3dc   :  { %v2763_v17 = vpop.f32.mrf.mxu0 }
 0x3dd   :  { %v2764_v36 = vadd.f32 %v2973_v43, %v2763_v17 }
 0x3de   :  { %v3275_v12 = vpop.f32.mrf.mxu0 }
 0x3df   :  { %2769 = vst [vmem:[#allocation8] sm:$0xff] %v2764_v36 }
 0x3e0   :  { %v2766_v11 = vpop.f32.mrf.mxu0 }
 0x3e1   :  { %3387 = shalt.err (!%p3384_p5)
}
 0x3e2   :  { %2779 = dma.vmem_to_hbm [thread:$0]  %s2777_s1, 128, %s4680_s7, [#allocation4]   ;;  %v3276_v0 = vpop.f32.mrf.mxu0 }
 0x3e3   :  { %3400 = dma.done.wait [#allocation4], 128  }
 0x3e4   :  { %3401 = vsyncadd [#allocation4], 4294967168 }
 0x3e5   :  { %2783 = vsyncpa [#allocation3], 1 }
 0x3e6   :  { %2784 = vsyncpa [#allocation6], 1 }
 0x3e7   :  { %2785 = vsyncpa [#allocation4], 1 }

</bundles_post_ra>
